<compile_context>
chip_gen: v6e
topology: v6e:2x2x1
jax: 0.10.0
libtpu: 0.0.40
codegen_flags: <defaults>
</compile_context>

<pallas_src>
import numpy as np
import jax
import jax.numpy as jnp
from jax import lax
from jax.experimental import pallas as pl
from jax.experimental.pallas import tpu as pltpu

EPS = 1e-5            # nn.BatchNorm2d default eps
KH = KW = 3
C1, C2, NCLS = 32, 64, 10
NCLS_PAD = 128        # lane-padded class dim for an unmasked store


def _round_up(x, m):
    return -(-x // m) * m


def _make_kernel(nblk, h1, w1p, h2, w2p):
    mb2 = nblk * h2 * w2p

    def kernel(xcol_ref, w1_ref, b1_ref, w2_ref, b2_ref, p_ref, wc_ref, bc_ref,
               out_ref):
        # ---- Conv2d(1,32,3x3) + folded BN + ReLU: one matmul over all patch rows ----
        f1 = jnp.dot(xcol_ref[...], w1_ref[...],
                     preferred_element_type=jnp.float32)      # (nblk*h1*w1p, C1)
        f1 = jnp.maximum(f1 + b1_ref[...], 0.0)
        # TODO(synk): Dropout(0.5) is identity in eval mode; training-mode RNG
        # masking is not reproduced.
        # Tiling-preserving reshape (w1p % 8 == 0), then one bf16 cast for the MXU.
        feat1 = f1.reshape(nblk, h1, w1p, C1).astype(jnp.bfloat16)

        # ---- Conv2d(32,64,3x3) + folded BN: 9 accumulating matmuls (M = mb2) ----
        acc2 = jnp.zeros((mb2, C2), jnp.float32)
        for k in range(KH * KW):
            dy, dx = k // KW, k % KW
            patch = feat1[:, dy:dy + h2, dx:dx + w2p, :].reshape(mb2, C1)
            acc2 = acc2 + jnp.dot(patch, w2_ref[k],
                                  preferred_element_type=jnp.float32)
        f2 = jnp.maximum(acc2 + b2_ref[...], 0.0)             # (mb2, C2)

        # ---- AdaptiveAvgPool2d((1,1)): masked per-image mean as one matmul ----
        pooled = jnp.dot(p_ref[...], f2,
                         preferred_element_type=jnp.float32)  # (nblk, C2)

        # ---- Linear(64,10), lane-padded to 128 ----
        logits = jnp.dot(pooled, wc_ref[...],
                         preferred_element_type=jnp.float32) + bc_ref[...]
        out_ref[...] = logits.reshape(1, nblk, NCLS_PAD)

    return kernel


def _pick_nblk(n):
    # Amortize grid-step overhead over up to 8 images, but keep >= 2 grid
    # steps when possible so v7x megacore can split the batch axis.
    for nb in (8, 4, 2):
        if n % nb == 0 and n // nb >= 2:
            return nb
    return 1


def backbone_forward(x_nhwc, params):
    (w1, b1, g1, be1, m1, v1, w2, b2, g2, be2, m2, v2, wc, bc) = params
    n, h, w, _ = x_nhwc.shape
    h1, w1r = h - (KH - 1), w - (KW - 1)        # real conv1 output size
    h2, w2r = h1 - (KH - 1), w1r - (KW - 1)     # real conv2 output size
    w2p = _round_up(w2r, 16)                    # conv2 width, bf16-tile aligned
    w1p = _round_up(w2p + KW - 1, 16)           # conv1 width, tile aligned
    wxp = w1p + KW - 1                          # padded input width

    nblk = _pick_nblk(n)
    grid = n // nblk
    mb2 = nblk * h2 * w2p

    # ---- host-side folding of eval-mode BatchNorm into conv weights/biases ----
    s1 = g1 * lax.rsqrt(v1 + EPS)
    w1f = w1 * s1                                              # (9, C1)
    b1f = (b1 - m1) * s1 + be1                                 # (1, C1)
    s2 = g2 * lax.rsqrt(v2 + EPS)
    w2f = (w2 * s2).reshape(KH * KW, C1, C2).astype(jnp.bfloat16)
    b2f = (b2 - m2) * s2 + be2                                 # (1, C2)
    wcf = jnp.zeros((C2, NCLS_PAD), jnp.float32).at[:, :NCLS].set(wc)
    bcf = jnp.zeros((1, NCLS_PAD), jnp.float32).at[:, :NCLS].set(bc)

    # ---- wrapper-side layout plumbing (zero FLOPs): pad + im2col for conv1 ----
    xp = jnp.pad(x_nhwc[..., 0], ((0, 0), (0, 0), (0, wxp - w)))   # (N, H, wxp)
    cols = [xp[:, dy:dy + h1, dx:dx + w1p]
            for dy in range(KH) for dx in range(KW)]               # each (N, h1, w1p)
    xcol = jnp.stack(cols, axis=-1).reshape(n * h1 * w1p, KH * KW)

    # ---- pooling matrix: picks each image's valid h2 x w2r window and applies
    #      the 1/(h2*w2r) average inside the same matmul; padded columns get 0 ----
    pmat = np.zeros((nblk, mb2), np.float32)
    inv_cnt = 1.0 / float(h2 * w2r)
    for i in range(nblk):
        for hh in range(h2):
            base = (i * h2 + hh) * w2p
            pmat[i, base:base + w2r] = inv_cnt
    pmat = jnp.asarray(pmat)

    kernel = _make_kernel(nblk, h1, w1p, h2, w2p)

    def full(shape):
        zeros = (0,) * len(shape)
        return pl.BlockSpec(shape, lambda i: zeros)

    out = pl.pallas_call(
        kernel,
        out_shape=jax.ShapeDtypeStruct((grid, nblk, NCLS_PAD), jnp.float32),
        grid_spec=pltpu.PrefetchScalarGridSpec(
            num_scalar_prefetch=0,
            grid=(grid,),
            in_specs=[
                pl.BlockSpec((nblk * h1 * w1p, KH * KW), lambda i: (i, 0)),
                full((KH * KW, C1)), full((1, C1)),            # conv1 weight/bias (BN folded)
                full((KH * KW, C1, C2)), full((1, C2)),        # conv2 weight/bias (BN folded)
                full((nblk, mb2)),                             # pooling matrix
                full((C2, NCLS_PAD)), full((1, NCLS_PAD)),     # classifier weight/bias
            ],
            out_specs=pl.BlockSpec((1, nblk, NCLS_PAD), lambda i: (i, 0, 0)),
        ),
        compiler_params=pltpu.CompilerParams(
            dimension_semantics=("parallel",)),
    )(xcol, w1f, b1f, w2f, b2f, pmat, wcf, bcf)
    return out.reshape(n, NCLS_PAD)[:, :NCLS]


def init_params(key):
    ks = jax.random.split(key, 14)
    f32 = jnp.float32
    w1 = jax.random.normal(ks[0], (KH * KW, C1), f32) * 0.3
    b1 = jax.random.normal(ks[1], (1, C1), f32) * 0.1
    g1 = jax.random.uniform(ks[2], (1, C1), f32, minval=0.8, maxval=1.2)
    be1 = jax.random.normal(ks[3], (1, C1), f32) * 0.1
    m1 = jax.random.normal(ks[4], (1, C1), f32) * 0.1
    v1 = jax.random.uniform(ks[5], (1, C1), f32, minval=0.5, maxval=1.5)
    w2 = jax.random.normal(ks[6], (KH * KW * C1, C2), f32) * 0.08
    b2 = jax.random.normal(ks[7], (1, C2), f32) * 0.1
    g2 = jax.random.uniform(ks[8], (1, C2), f32, minval=0.8, maxval=1.2)
    be2 = jax.random.normal(ks[9], (1, C2), f32) * 0.1
    m2 = jax.random.normal(ks[10], (1, C2), f32) * 0.1
    v2 = jax.random.uniform(ks[11], (1, C2), f32, minval=0.5, maxval=1.5)
    wc = jax.random.normal(ks[12], (C2, NCLS), f32) * 0.1
    bc = jax.random.normal(ks[13], (1, NCLS), f32) * 0.1
    return (w1, b1, g1, be1, m1, v1, w2, b2, g2, be2, m2, v2, wc, bc)


def reference_forward(x_nhwc, params):
    """Pure-JAX reference of the PyTorch forward (eval mode, f32 HIGHEST)."""
    (w1, b1, g1, be1, m1, v1, w2, b2, g2, be2, m2, v2, wc, bc) = params
    dn = ('NHWC', 'HWIO', 'NHWC')

    def bn(y, g, be, m, v):
        r = lambda t: t.reshape(1, 1, 1, -1)
        return (y - r(m)) * lax.rsqrt(r(v) + EPS) * r(g) + r(be)

    y1 = lax.conv_general_dilated(x_nhwc, w1.reshape(KH, KW, 1, C1), (1, 1), 'VALID',
                                  dimension_numbers=dn,
                                  precision=lax.Precision.HIGHEST) + b1.reshape(1, 1, 1, C1)
    f1 = jnp.maximum(bn(y1, g1, be1, m1, v1), 0.0)
    y2 = lax.conv_general_dilated(f1, w2.reshape(KH, KW, C1, C2), (1, 1), 'VALID',
                                  dimension_numbers=dn,
                                  precision=lax.Precision.HIGHEST) + b2.reshape(1, 1, 1, C2)
    f2 = jnp.maximum(bn(y2, g2, be2, m2, v2), 0.0)
    pooled = jnp.mean(f2, axis=(1, 2))
    return jnp.dot(pooled, wc, precision=lax.Precision.HIGHEST) + bc


if __name__ == "__main__":
    key = jax.random.PRNGKey(0)
    kx, kp = jax.random.split(key)

    N, H, W = 2, 16, 16
    # PyTorch input would be NCHW (2, 1, 16, 16); kernel consumes NHWC.
    x_nchw = jax.random.normal(kx, (N, 1, H, W), jnp.float32)
    x_nhwc = jnp.transpose(x_nchw, (0, 2, 3, 1))

    params = init_params(kp)

    fwd = jax.jit(backbone_forward)
    out = fwd(x_nhwc, params)
    out = jax.block_until_ready(out)

    ref = reference_forward(x_nhwc, params)
    # Kernel uses bf16 MXU operands for conv2 (per perf guidance) with f32
    # accumulation; tolerance is sized for that while still catching any
    # structural/indexing error by orders of magnitude.
    np.testing.assert_allclose(np.asarray(out), np.asarray(ref), rtol=2e-2, atol=2e-2)

    print("KERNEL_OK")
</pallas_src>

<mosaic_0001>
module attributes {stable_mosaic.version = 11 : i64} {
  func.func @kernel(%arg0: i32, %arg1: memref<448x9xf32, #tpu.memory_space<vmem>>, %arg2: memref<9x32xf32, #tpu.memory_space<vmem>>, %arg3: memref<1x32xf32, #tpu.memory_space<vmem>>, %arg4: memref<9x32x64xbf16, #tpu.memory_space<vmem>>, %arg5: memref<1x64xf32, #tpu.memory_space<vmem>>, %arg6: memref<1x192xf32, #tpu.memory_space<vmem>>, %arg7: memref<64x128xf32, #tpu.memory_space<vmem>>, %arg8: memref<1x128xf32, #tpu.memory_space<vmem>>, %arg9: memref<1x1x128xf32, #tpu.memory_space<vmem>>) attributes {dimension_semantics = [#tpu.dimension_semantics<parallel>], iteration_bounds = array<i64: 2>, scalar_prefetch = 0 : i64, scratch_operands = 0 : i64, tpu.core_type = #tpu.core_type<tc>, window_params = [{transform_indices = @transform_0, window_bounds = array<i64: 448, 9>}, {pipeline_mode = #tpu.pipeline_mode<synchronous>, transform_indices = @transform_1, window_bounds = array<i64: 9, 32>}, {pipeline_mode = #tpu.pipeline_mode<synchronous>, transform_indices = @transform_2, window_bounds = array<i64: 1, 32>}, {pipeline_mode = #tpu.pipeline_mode<synchronous>, transform_indices = @transform_3, window_bounds = array<i64: 9, 32, 64>}, {pipeline_mode = #tpu.pipeline_mode<synchronous>, transform_indices = @transform_4, window_bounds = array<i64: 1, 64>}, {pipeline_mode = #tpu.pipeline_mode<synchronous>, transform_indices = @transform_5, window_bounds = array<i64: 1, 192>}, {pipeline_mode = #tpu.pipeline_mode<synchronous>, transform_indices = @transform_6, window_bounds = array<i64: 64, 128>}, {pipeline_mode = #tpu.pipeline_mode<synchronous>, transform_indices = @transform_7, window_bounds = array<i64: 1, 128>}, {transform_indices = @transform_8, window_bounds = array<i64: 1, 1, 128>}]} {
    %c0 = arith.constant 0 : index
    %c0_0 = arith.constant 0 : index
    %0 = vector.load %arg1[%c0, %c0_0] : memref<448x9xf32, #tpu.memory_space<vmem>>, vector<448x9xf32>
    %c0_1 = arith.constant 0 : index
    %c0_2 = arith.constant 0 : index
    %1 = vector.load %arg2[%c0_1, %c0_2] : memref<9x32xf32, #tpu.memory_space<vmem>>, vector<9x32xf32>
    %cst = arith.constant dense<0.000000e+00> : vector<448x32xf32>
    %2 = tpu.matmul %0, %1, %cst {dimension_numbers = #tpu.dot_dimension_numbers<[1], [0], [0], [1], [0, 0, 1, 1], [], []>} : vector<448x9xf32>, vector<9x32xf32>, vector<448x32xf32> -> vector<448x32xf32>
    %c0_3 = arith.constant 0 : index
    %c0_4 = arith.constant 0 : index
    %3 = vector.load %arg3[%c0_3, %c0_4] : memref<1x32xf32, #tpu.memory_space<vmem>>, vector<1x32xf32>
    %4 = vector.broadcast %3 : vector<1x32xf32> to vector<448x32xf32>
    %5 = arith.addf %2, %4 : vector<448x32xf32>
    %cst_5 = arith.constant 0.000000e+00 : f32
    %6 = vector.broadcast %cst_5 : f32 to vector<448x32xf32>
    %7 = arith.maximumf %5, %6 : vector<448x32xf32>
    %8 = vector.shape_cast %7 : vector<448x32xf32> to vector<1x14x32x32xf32>
    %9 = arith.truncf %8 : vector<1x14x32x32xf32> to vector<1x14x32x32xbf16>
    %cst_6 = arith.constant 0.000000e+00 : f32
    %10 = vector.broadcast %cst_6 : f32 to vector<192x64xf32>
    %11 = vector.extract_strided_slice %9 {offsets = [0, 0, 0, 0], sizes = [1, 12, 16, 32], strides = [1, 1, 1, 1]} : vector<1x14x32x32xbf16> to vector<1x12x16x32xbf16>
    %12 = vector.shape_cast %11 : vector<1x12x16x32xbf16> to vector<192x32xbf16>
    %c0_7 = arith.constant 0 : index
    %c0_8 = arith.constant 0 : index
    %c0_9 = arith.constant 0 : index
    %13 = vector.load %arg4[%c0_7, %c0_8, %c0_9] : memref<9x32x64xbf16, #tpu.memory_space<vmem>>, vector<1x32x64xbf16>
    %14 = vector.shape_cast %13 : vector<1x32x64xbf16> to vector<32x64xbf16>
    %cst_10 = arith.constant dense<0.000000e+00> : vector<192x64xf32>
    %15 = tpu.matmul %12, %14, %cst_10 {dimension_numbers = #tpu.dot_dimension_numbers<[1], [0], [0], [1], [0, 0, 1, 1], [], []>} : vector<192x32xbf16>, vector<32x64xbf16>, vector<192x64xf32> -> vector<192x64xf32>
    %16 = arith.addf %10, %15 : vector<192x64xf32>
    %17 = vector.extract_strided_slice %9 {offsets = [0, 0, 1, 0], sizes = [1, 12, 16, 32], strides = [1, 1, 1, 1]} : vector<1x14x32x32xbf16> to vector<1x12x16x32xbf16>
    %18 = vector.shape_cast %17 : vector<1x12x16x32xbf16> to vector<192x32xbf16>
    %c1 = arith.constant 1 : index
    %c0_11 = arith.constant 0 : index
    %c0_12 = arith.constant 0 : index
    %19 = vector.load %arg4[%c1, %c0_11, %c0_12] : memref<9x32x64xbf16, #tpu.memory_space<vmem>>, vector<1x32x64xbf16>
    %20 = vector.shape_cast %19 : vector<1x32x64xbf16> to vector<32x64xbf16>
    %cst_13 = arith.constant dense<0.000000e+00> : vector<192x64xf32>
    %21 = tpu.matmul %18, %20, %cst_13 {dimension_numbers = #tpu.dot_dimension_numbers<[1], [0], [0], [1], [0, 0, 1, 1], [], []>} : vector<192x32xbf16>, vector<32x64xbf16>, vector<192x64xf32> -> vector<192x64xf32>
    %22 = arith.addf %16, %21 : vector<192x64xf32>
    %23 = vector.extract_strided_slice %9 {offsets = [0, 0, 2, 0], sizes = [1, 12, 16, 32], strides = [1, 1, 1, 1]} : vector<1x14x32x32xbf16> to vector<1x12x16x32xbf16>
    %24 = vector.shape_cast %23 : vector<1x12x16x32xbf16> to vector<192x32xbf16>
    %c2 = arith.constant 2 : index
    %c0_14 = arith.constant 0 : index
    %c0_15 = arith.constant 0 : index
    %25 = vector.load %arg4[%c2, %c0_14, %c0_15] : memref<9x32x64xbf16, #tpu.memory_space<vmem>>, vector<1x32x64xbf16>
    %26 = vector.shape_cast %25 : vector<1x32x64xbf16> to vector<32x64xbf16>
    %cst_16 = arith.constant dense<0.000000e+00> : vector<192x64xf32>
    %27 = tpu.matmul %24, %26, %cst_16 {dimension_numbers = #tpu.dot_dimension_numbers<[1], [0], [0], [1], [0, 0, 1, 1], [], []>} : vector<192x32xbf16>, vector<32x64xbf16>, vector<192x64xf32> -> vector<192x64xf32>
    %28 = arith.addf %22, %27 : vector<192x64xf32>
    %29 = vector.extract_strided_slice %9 {offsets = [0, 1, 0, 0], sizes = [1, 12, 16, 32], strides = [1, 1, 1, 1]} : vector<1x14x32x32xbf16> to vector<1x12x16x32xbf16>
    %30 = vector.shape_cast %29 : vector<1x12x16x32xbf16> to vector<192x32xbf16>
    %c3 = arith.constant 3 : index
    %c0_17 = arith.constant 0 : index
    %c0_18 = arith.constant 0 : index
    %31 = vector.load %arg4[%c3, %c0_17, %c0_18] : memref<9x32x64xbf16, #tpu.memory_space<vmem>>, vector<1x32x64xbf16>
    %32 = vector.shape_cast %31 : vector<1x32x64xbf16> to vector<32x64xbf16>
    %cst_19 = arith.constant dense<0.000000e+00> : vector<192x64xf32>
    %33 = tpu.matmul %30, %32, %cst_19 {dimension_numbers = #tpu.dot_dimension_numbers<[1], [0], [0], [1], [0, 0, 1, 1], [], []>} : vector<192x32xbf16>, vector<32x64xbf16>, vector<192x64xf32> -> vector<192x64xf32>
    %34 = arith.addf %28, %33 : vector<192x64xf32>
    %35 = vector.extract_strided_slice %9 {offsets = [0, 1, 1, 0], sizes = [1, 12, 16, 32], strides = [1, 1, 1, 1]} : vector<1x14x32x32xbf16> to vector<1x12x16x32xbf16>
    %36 = vector.shape_cast %35 : vector<1x12x16x32xbf16> to vector<192x32xbf16>
    %c4 = arith.constant 4 : index
    %c0_20 = arith.constant 0 : index
    %c0_21 = arith.constant 0 : index
    %37 = vector.load %arg4[%c4, %c0_20, %c0_21] : memref<9x32x64xbf16, #tpu.memory_space<vmem>>, vector<1x32x64xbf16>
    %38 = vector.shape_cast %37 : vector<1x32x64xbf16> to vector<32x64xbf16>
    %cst_22 = arith.constant dense<0.000000e+00> : vector<192x64xf32>
    %39 = tpu.matmul %36, %38, %cst_22 {dimension_numbers = #tpu.dot_dimension_numbers<[1], [0], [0], [1], [0, 0, 1, 1], [], []>} : vector<192x32xbf16>, vector<32x64xbf16>, vector<192x64xf32> -> vector<192x64xf32>
    %40 = arith.addf %34, %39 : vector<192x64xf32>
    %41 = vector.extract_strided_slice %9 {offsets = [0, 1, 2, 0], sizes = [1, 12, 16, 32], strides = [1, 1, 1, 1]} : vector<1x14x32x32xbf16> to vector<1x12x16x32xbf16>
    %42 = vector.shape_cast %41 : vector<1x12x16x32xbf16> to vector<192x32xbf16>
    %c5 = arith.constant 5 : index
    %c0_23 = arith.constant 0 : index
    %c0_24 = arith.constant 0 : index
    %43 = vector.load %arg4[%c5, %c0_23, %c0_24] : memref<9x32x64xbf16, #tpu.memory_space<vmem>>, vector<1x32x64xbf16>
    %44 = vector.shape_cast %43 : vector<1x32x64xbf16> to vector<32x64xbf16>
    %cst_25 = arith.constant dense<0.000000e+00> : vector<192x64xf32>
    %45 = tpu.matmul %42, %44, %cst_25 {dimension_numbers = #tpu.dot_dimension_numbers<[1], [0], [0], [1], [0, 0, 1, 1], [], []>} : vector<192x32xbf16>, vector<32x64xbf16>, vector<192x64xf32> -> vector<192x64xf32>
    %46 = arith.addf %40, %45 : vector<192x64xf32>
    %47 = vector.extract_strided_slice %9 {offsets = [0, 2, 0, 0], sizes = [1, 12, 16, 32], strides = [1, 1, 1, 1]} : vector<1x14x32x32xbf16> to vector<1x12x16x32xbf16>
    %48 = vector.shape_cast %47 : vector<1x12x16x32xbf16> to vector<192x32xbf16>
    %c6 = arith.constant 6 : index
    %c0_26 = arith.constant 0 : index
    %c0_27 = arith.constant 0 : index
    %49 = vector.load %arg4[%c6, %c0_26, %c0_27] : memref<9x32x64xbf16, #tpu.memory_space<vmem>>, vector<1x32x64xbf16>
    %50 = vector.shape_cast %49 : vector<1x32x64xbf16> to vector<32x64xbf16>
    %cst_28 = arith.constant dense<0.000000e+00> : vector<192x64xf32>
    %51 = tpu.matmul %48, %50, %cst_28 {dimension_numbers = #tpu.dot_dimension_numbers<[1], [0], [0], [1], [0, 0, 1, 1], [], []>} : vector<192x32xbf16>, vector<32x64xbf16>, vector<192x64xf32> -> vector<192x64xf32>
    %52 = arith.addf %46, %51 : vector<192x64xf32>
    %53 = vector.extract_strided_slice %9 {offsets = [0, 2, 1, 0], sizes = [1, 12, 16, 32], strides = [1, 1, 1, 1]} : vector<1x14x32x32xbf16> to vector<1x12x16x32xbf16>
    %54 = vector.shape_cast %53 : vector<1x12x16x32xbf16> to vector<192x32xbf16>
    %c7 = arith.constant 7 : index
    %c0_29 = arith.constant 0 : index
    %c0_30 = arith.constant 0 : index
    %55 = vector.load %arg4[%c7, %c0_29, %c0_30] : memref<9x32x64xbf16, #tpu.memory_space<vmem>>, vector<1x32x64xbf16>
    %56 = vector.shape_cast %55 : vector<1x32x64xbf16> to vector<32x64xbf16>
    %cst_31 = arith.constant dense<0.000000e+00> : vector<192x64xf32>
    %57 = tpu.matmul %54, %56, %cst_31 {dimension_numbers = #tpu.dot_dimension_numbers<[1], [0], [0], [1], [0, 0, 1, 1], [], []>} : vector<192x32xbf16>, vector<32x64xbf16>, vector<192x64xf32> -> vector<192x64xf32>
    %58 = arith.addf %52, %57 : vector<192x64xf32>
    %59 = vector.extract_strided_slice %9 {offsets = [0, 2, 2, 0], sizes = [1, 12, 16, 32], strides = [1, 1, 1, 1]} : vector<1x14x32x32xbf16> to vector<1x12x16x32xbf16>
    %60 = vector.shape_cast %59 : vector<1x12x16x32xbf16> to vector<192x32xbf16>
    %c8 = arith.constant 8 : index
    %c0_32 = arith.constant 0 : index
    %c0_33 = arith.constant 0 : index
    %61 = vector.load %arg4[%c8, %c0_32, %c0_33] : memref<9x32x64xbf16, #tpu.memory_space<vmem>>, vector<1x32x64xbf16>
    %62 = vector.shape_cast %61 : vector<1x32x64xbf16> to vector<32x64xbf16>
    %cst_34 = arith.constant dense<0.000000e+00> : vector<192x64xf32>
    %63 = tpu.matmul %60, %62, %cst_34 {dimension_numbers = #tpu.dot_dimension_numbers<[1], [0], [0], [1], [0, 0, 1, 1], [], []>} : vector<192x32xbf16>, vector<32x64xbf16>, vector<192x64xf32> -> vector<192x64xf32>
    %64 = arith.addf %58, %63 : vector<192x64xf32>
    %c0_35 = arith.constant 0 : index
    %c0_36 = arith.constant 0 : index
    %65 = vector.load %arg5[%c0_35, %c0_36] : memref<1x64xf32, #tpu.memory_space<vmem>>, vector<1x64xf32>
    %66 = vector.broadcast %65 : vector<1x64xf32> to vector<192x64xf32>
    %67 = arith.addf %64, %66 : vector<192x64xf32>
    %cst_37 = arith.constant 0.000000e+00 : f32
    %68 = vector.broadcast %cst_37 : f32 to vector<192x64xf32>
    %69 = arith.maximumf %67, %68 : vector<192x64xf32>
    %c0_38 = arith.constant 0 : index
    %c0_39 = arith.constant 0 : index
    %70 = vector.load %arg6[%c0_38, %c0_39] : memref<1x192xf32, #tpu.memory_space<vmem>>, vector<1x192xf32>
    %cst_40 = arith.constant dense<0.000000e+00> : vector<1x64xf32>
    %71 = tpu.matmul %70, %69, %cst_40 {dimension_numbers = #tpu.dot_dimension_numbers<[1], [0], [0], [1], [0, 0, 1, 1], [], []>} : vector<1x192xf32>, vector<192x64xf32>, vector<1x64xf32> -> vector<1x64xf32>
    %c0_41 = arith.constant 0 : index
    %c0_42 = arith.constant 0 : index
    %72 = vector.load %arg7[%c0_41, %c0_42] : memref<64x128xf32, #tpu.memory_space<vmem>>, vector<64x128xf32>
    %cst_43 = arith.constant dense<0.000000e+00> : vector<1x128xf32>
    %73 = tpu.matmul %71, %72, %cst_43 {dimension_numbers = #tpu.dot_dimension_numbers<[1], [0], [0], [1], [0, 0, 1, 1], [], []>} : vector<1x64xf32>, vector<64x128xf32>, vector<1x128xf32> -> vector<1x128xf32>
    %c0_44 = arith.constant 0 : index
    %c0_45 = arith.constant 0 : index
    %74 = vector.load %arg8[%c0_44, %c0_45] : memref<1x128xf32, #tpu.memory_space<vmem>>, vector<1x128xf32>
    %75 = arith.addf %73, %74 : vector<1x128xf32>
    %76 = vector.shape_cast %75 : vector<1x128xf32> to vector<1x1x128xf32>
    %c0_46 = arith.constant 0 : index
    %c0_47 = arith.constant 0 : index
    %c0_48 = arith.constant 0 : index
    %77 = vector.load %arg9[%c0_46, %c0_47, %c0_48] : memref<1x1x128xf32, #tpu.memory_space<vmem>>, vector<1x1x128xf32>
    tpu.vector_store %arg9[%c0_46, %c0_47, %c0_48], %76 {strides = array<i32>} : memref<1x1x128xf32, #tpu.memory_space<vmem>>, vector<1x1x128xf32>,
    return
  }
  func.func @transform_0(%arg0: i32) -> (i32, i32) {
    %c0_i32 = arith.constant 0 : i32
    %c0_i32_0 = arith.constant 0 : i32
    return %arg0, %c0_i32 : i32, i32
  }
  func.func @transform_1(%arg0: i32) -> (i32, i32) {
    %c0_i32 = arith.constant 0 : i32
    %c0_i32_0 = arith.constant 0 : i32
    %c0_i32_1 = arith.constant 0 : i32
    return %c0_i32, %c0_i32_0 : i32, i32
  }
  func.func @transform_2(%arg0: i32) -> (i32, i32) {
    %c0_i32 = arith.constant 0 : i32
    %c0_i32_0 = arith.constant 0 : i32
    %c0_i32_1 = arith.constant 0 : i32
    return %c0_i32, %c0_i32_0 : i32, i32
  }
  func.func @transform_3(%arg0: i32) -> (i32, i32, i32) {
    %c0_i32 = arith.constant 0 : i32
    %c0_i32_0 = arith.constant 0 : i32
    %c0_i32_1 = arith.constant 0 : i32
    %c0_i32_2 = arith.constant 0 : i32
    return %c0_i32, %c0_i32_0, %c0_i32_1 : i32, i32, i32
  }
  func.func @transform_4(%arg0: i32) -> (i32, i32) {
    %c0_i32 = arith.constant 0 : i32
    %c0_i32_0 = arith.constant 0 : i32
    %c0_i32_1 = arith.constant 0 : i32
    return %c0_i32, %c0_i32_0 : i32, i32
  }
  func.func @transform_5(%arg0: i32) -> (i32, i32) {
    %c0_i32 = arith.constant 0 : i32
    %c0_i32_0 = arith.constant 0 : i32
    %c0_i32_1 = arith.constant 0 : i32
    return %c0_i32, %c0_i32_0 : i32, i32
  }
  func.func @transform_6(%arg0: i32) -> (i32, i32) {
    %c0_i32 = arith.constant 0 : i32
    %c0_i32_0 = arith.constant 0 : i32
    %c0_i32_1 = arith.constant 0 : i32
    return %c0_i32, %c0_i32_0 : i32, i32
  }
  func.func @transform_7(%arg0: i32) -> (i32, i32) {
    %c0_i32 = arith.constant 0 : i32
    %c0_i32_0 = arith.constant 0 : i32
    %c0_i32_1 = arith.constant 0 : i32
    return %c0_i32, %c0_i32_0 : i32, i32
  }
  func.func @transform_8(%arg0: i32) -> (i32, i32, i32) {
    %c0_i32 = arith.constant 0 : i32
    %c0_i32_0 = arith.constant 0 : i32
    %c0_i32_1 = arith.constant 0 : i32
    return %arg0, %c0_i32, %c0_i32_0 : i32, i32, i32
  }
}

</mosaic_0001>

<bundles_post_ra>
// kernel: backbone_forward.1
= control target key start
LH: loop header
LB: loop body
LE: loop exit
PB: predicated region body
PF: predicated region fallthrough
CT: control target
= control target key end

     0   :  { %13 = vsyncpa [#allocation3], 0  ;;  %s5427_s0 = inlined_call_operand.vmem [shape: f32[896,9], index: 0, kind: input, shape index: {}]   ;;  %s5428_s1 = inlined_call_operand.vmem [shape: f32[9,32], index: 1, kind: input, shape index: {}]   ;;  %s5429_s2 = inlined_call_operand.vmem [shape: f32[1,32], index: 2, kind: input, shape index: {}]   ;;  %s5430_s3 = inlined_call_operand.vmem [shape: bf16[9,32,64], index: 3, kind: input, shape index: {}]   ;;  %s5431_s4 = inlined_call_operand.vmem [shape: f32[1,64], index: 4, kind: input, shape index: {}]   ;;  %s5432_s5 = inlined_call_operand.vmem [shape: f32[1,192], index: 5, kind: input, shape index: {}]   ;;  %s5433_s6 = inlined_call_operand.vmem [shape: f32[64,128], index: 6, kind: input, shape index: {}]   ;;  %s5434_s7 = inlined_call_operand.vmem [shape: f32[1,128], index: 7, kind: input, shape index: {}]   ;;  %s5435_s8 = inlined_call_operand.hbm [shape: f32[2,1,128], index: 8, kind: output, shape index: {}]  }
   0x1   :  { %15 = vsyncpa [#allocation3 + $0x1], 0  ;;  %s4049_s27 = smov 0   ;;  %s4051_s28 = smov 0  }
   0x2   :  { %s4053_s29 = smov 0   ;;  %s4055_s30 = smov 0  }
   0x3 LB: > { %s4070_s9 = sadd.s32 4294967295, %s3999_s30   ;;  %s3097_s10 = sadd.s32 4294967294, %s3999_s30   ;;  %s3999_s30 = sphi %s4055_s30, %s5478_s30   ;;  %s3995_s29 = sphi %s4053_s29, %s5477_s29   ;;  %s3991_s28 = sphi %s4051_s28, %s5476_s28   ;;  %s3987_s27 = sphi %s4049_s27, %s5475_s27  }
   0x4   : > { %s4074_s11 = sadd.s32 1, %s3999_s30   ;;  %s201_s12 = sadd.s32 1, %s3995_s29 }
   0x5   : > { %s198_s13 = ssub.s32 %s3999_s30, %s4074_s11  ;;  %p211_p0 = scmp.ne.s32.totalorder %s3995_s29, %s3991_s28 }
   0x6   : > { %p199_p1 = scmp.eq.s32.totalorder %s198_s13, 0  ;;  %p212_p2 = scmp.eq.s32.totalorder %s4070_s9, 1 }
   0x7   : > { %p217_p3 = scmp.ne.s32.totalorder %s3991_s28, %s3987_s27  ;;  %p218_p4 = scmp.eq.s32.totalorder %s3097_s10, 1 }
   0x8   : > { %s4085_s14 = scalar_select %p199_p1, %s3995_s29, %s201_s12  }
   0x9   : > { %p4087_p5 = por %p212_p2, %p211_p0  ;;  %p4091_p6 = por %p218_p4, %p217_p3 }
   0xa   : > { %p3100_p7 = scmp.ge.s32.totalorder %s3999_s30, 1  ;;  %p266_p8 = scmp.lt.s32.totalorder %s3999_s30, 3 }
   0xc   : > { %p267_p9 = pnand %p3100_p7, %p266_p8 }
   0xe   : > { %270 = sbr.rel (%p267_p9) target bundleno = 1201 (0x4b1), region = 52 }
  0x13   : > { %v363_v0 = vld [vmem:[%s5428_s1 + $0x8] sm:$0x1]  ;;  %vm540_vm0 = vcmask 1040384   ;;  %v362_v1 = vld [vmem:[%s5428_s1] sm:$0xff]  ;;  %s299_s21 = smul.u32 56, %s4070_s9  ;;  %vm371_vm1 = vcmask 72704  }
  0x14   : > { %3517 = vmatprep.subr.msk.mxu0 %vm540_vm0, %v363_v0  ;;  %v3921_v45 = vld [vmem:[%s5430_s3 + $0x18] sm:$0xff]   ;;  %v3922_v49 = vld [vmem:[%s5430_s3 + $0x10] sm:$0xff]   ;;  %v4236_v61 = vld [vmem:[%s5430_s3 + $0x8] sm:$0xff]   ;;  %vm977_vm2 = vsmask.f32 7424  ;;  %vm1139_vm3 = vcmask 261120  }
  0x15   : > { %3518 = vmatpush3.msk.msra.mxu0 %vm540_vm0, %v363_v0  ;;  %p300_p10 = scmp.lt.s32.totalorder %s299_s21, 111  ;;  %3876 = vmatprep.subr.bf16.mxu1 %v3921_v45  ;;  %v4213_v52 = vld [vmem:[%s5430_s3 + $0x38] sm:$0xff]   ;;  %v4242_v62 = vld [vmem:[%s5429_s2] ss:$0 sm:$0xff]  ;;  %vm1494_vm4 = vcmask 1046528   ;;  %vm2873_vm5 = vcmask 523264  }
  0x16   : > { %3519 = vmatprep.subr.mxu0 %v362_v1  ;;  %3878 = vmatpush3.bf16.msra.mxu1 %v3921_v45  ;;  %vm4002_vm6 = vmmov 0   ;;  %s297_s19 = sand.u32 1, %s3991_s28   ;;  %s4003_s17 = smov [#allocation2]  }
  0x17   : > { %3520 = vmatpush3.msra.mxu0 %v362_v1  ;;  %s5480_s21 = smov (!%p300_p10, %s299_s21), 111  ;;  %3877 = vmatprep.subr.bf16.mxu1 %v3922_v49  ;;  %s298_s23 = scalar_lea.vmem [#allocation2], %s297_s19 }
  0x18   : > { %s3101_s22 = sshll.u32 %s5480_s21, 3  ;;  %3605 = vmatprep.subr.bf16.mxu0 %v3921_v45  ;;  %s3042_s24 = sshll.u32 %s298_s23, 4  ;;  %s3043_s24 = int_to_ptr.vmem [resolvable:$true] %s3042_s24 }
  0x19   : > { %s4107_s25 = scalar_lea.vmem %s5427_s0, %s3101_s22  ;;  %s3321_s22 = sshll.u32 %s4070_s9, 4 }
  0x1a   : > { %v306_v2 = vld [vmem:[%s4107_s25] sm:$0xff]  ;;  %v307_v3 = vld [vmem:[%s4107_s25 + $0x8] sm:$0xff]  ;;  %v308_v4 = vld [vmem:[%s4107_s25 + $0x10] sm:$0xff]  ;;  %3879 = vmatpush3.bf16.msra.mxu1 %v3922_v49  ;;  %s5392_s10 = scalar_lea.hbm %s5435_s8, %s3321_s22  ;;  %s3030_s12 = scalar_lea.sflag [#allocation3], %s297_s19 }
  0x1b   : > { %3521 = vmatprep.mubr.msk.f32.mxu0 %vm371_vm1, %v306_v2  ;;  %v309_v5 = vld [vmem:[%s4107_s25 + $0x18] sm:$0xff]  ;;  %v310_v6 = vld [vmem:[%s4107_s25 + $0x20] sm:$0xff]  ;;  %v311_v7 = vld [vmem:[%s4107_s25 + $0x28] sm:$0xff]  ;;  %3633 = vmatprep.subr.bf16.mxu1 %v4236_v61  ;;  %s3939_s13 = scalar_lea.vmem %s3043_s24, 16  ;;  %s3943_s9 = sshll.u32 %s4003_s17, 4  ;;  %s3944_s9 = int_to_ptr.vmem [resolvable:$false] %s3943_s9 }
  0x1c   : > { %3522 = vmatmul.mubr.msk.f32.vlgmr.msra.gmra.mxu0 %vm371_vm1, %v307_v3  ;;  %v312_v8 = vld [vmem:[%s4107_s25 + $0x30] sm:$0xff]  ;;  %v313_v9 = vld [vmem:[%s4107_s25 + $0x38] sm:$0xff]  ;;  %v314_v10 = vld [vmem:[%s4107_s25 + $0x40] sm:$0xff]  ;;  %p3940_p11 = scmp.ne.s32.totalorder %s3043_s24, %s3939_s13  ;;  %s3945_s18 = scalar_lea.vmem %s3944_s9, 32 }
  0x1d   : > { %3524 = vmatprep.mubr.msk.f32.mxu0 %vm371_vm1, %v308_v4  ;;  %v315_v11 = vld [vmem:[%s4107_s25 + $0x48] sm:$0xff]  ;;  %v316_v12 = vld [vmem:[%s4107_s25 + $0x50] sm:$0xff]  ;;  %v317_v13 = vld [vmem:[%s4107_s25 + $0x58] sm:$0xff]  ;;  %3606 = vmatpush3.bf16.msra.mxu0 %v3921_v45  ;;  %p3946_p0 = scmp.lt.s32.totalorder %s3043_s24, %s3944_s9  ;;  %p3947_p1 = scmp.lt.s32.totalorder %s3945_s18, %s3939_s13 }
  0x1e   : > { %v318_v14 = vld [vmem:[%s4107_s25 + $0x60] sm:$0xff]  ;;  %v319_v15 = vld [vmem:[%s4107_s25 + $0x68] sm:$0xff]  ;;  %v320_v16 = vld [vmem:[%s4107_s25 + $0x70] sm:$0xff]  ;;  %3607 = vmatprep.subr.bf16.mxu0 %v3922_v49  ;;  %p3941_p12 = pnand %p3940_p11, %p4087_p5 }
  0x1f   : > { %v321_v17 = vld [vmem:[%s4107_s25 + $0x78] sm:$0xff]  ;;  %v322_v18 = vld [vmem:[%s4107_s25 + $0x80] sm:$0xff]  ;;  %v323_v19 = vld [vmem:[%s4107_s25 + $0x88] sm:$0xff]  ;;  %p3948_p2 = por %p3947_p1, %p3946_p0 }
  0x20   : > { %3525 = vmatmul.mubr.msk.f32.gmra.mxu0 %vm371_vm1, %v309_v5  ;;  %v324_v20 = vld [vmem:[%s4107_s25 + $0x90] sm:$0xff]  ;;  %v325_v21 = vld [vmem:[%s4107_s25 + $0x98] sm:$0xff]  ;;  %v326_v22 = vld [vmem:[%s4107_s25 + $0xa0] sm:$0xff]  ;;  %p3942_p13 = pneg %p3941_p12 }
  0x21   : > { %3527 = vmatprep.mubr.msk.f32.mxu0 %vm371_vm1, %v310_v6  ;;  %v327_v23 = vld [vmem:[%s4107_s25 + $0xa8] sm:$0xff]  ;;  %v328_v24 = vld [vmem:[%s4107_s25 + $0xb0] sm:$0xff]  ;;  %v329_v25 = vld [vmem:[%s4107_s25 + $0xb8] sm:$0xff]  ;;  %3608 = vmatpush3.bf16.msra.mxu0 %v3922_v49 }
  0x22   : > { %v330_v26 = vld [vmem:[%s4107_s25 + $0xc0] sm:$0xff]  ;;  %v331_v27 = vld [vmem:[%s4107_s25 + $0xc8] sm:$0xff]  ;;  %v332_v28 = vld [vmem:[%s4107_s25 + $0xd0] sm:$0xff]  ;;  %3689 = vmatprep.subr.bf16.mxu0 %v4213_v52  ;;  %p3949_p3 = pnand %p3948_p2, %p3942_p13 }
  0x23   : > { %v333_v29 = vld [vmem:[%s4107_s25 + $0xd8] sm:$0xff]  ;;  %v334_v30 = vld [vmem:[%s4107_s25 + $0xe0] sm:$0xff]  ;;  %v335_v31 = vld [vmem:[%s4107_s25 + $0xe8] sm:$0xff] }
  0x24   : > { %3528 = vmatmul.mubr.msk.f32.gmra.mxu0 %vm371_vm1, %v311_v7  ;;  %v336_v32 = vld [vmem:[%s4107_s25 + $0xf0] sm:$0xff]  ;;  %v337_v33 = vld [vmem:[%s4107_s25 + $0xf8] sm:$0xff]  ;;  %v338_v34 = vld [vmem:[%s4107_s25 + $0x100] sm:$0xff] }
  0x25   : > { %3530 = vmatprep.mubr.msk.f32.mxu0 %vm371_vm1, %v312_v8  ;;  %v339_v35 = vld [vmem:[%s4107_s25 + $0x108] sm:$0xff]  ;;  %v340_v36 = vld [vmem:[%s4107_s25 + $0x110] sm:$0xff]  ;;  %v341_v37 = vld [vmem:[%s4107_s25 + $0x118] sm:$0xff] }
  0x26   : > { %v342_v38 = vld [vmem:[%s4107_s25 + $0x120] sm:$0xff]  ;;  %v343_v39 = vld [vmem:[%s4107_s25 + $0x128] sm:$0xff]  ;;  %v344_v40 = vld [vmem:[%s4107_s25 + $0x130] sm:$0xff] }
  0x27   : > { %v345_v41 = vld [vmem:[%s4107_s25 + $0x138] sm:$0xff]  ;;  %v346_v42 = vld [vmem:[%s4107_s25 + $0x140] sm:$0xff]  ;;  %v347_v43 = vld [vmem:[%s4107_s25 + $0x148] sm:$0xff] }
  0x28   : > { %3531 = vmatmul.mubr.msk.f32.gmra.mxu0 %vm371_vm1, %v313_v9  ;;  %v348_v44 = vld [vmem:[%s4107_s25 + $0x150] sm:$0xff]  ;;  %v349_v46 = vld [vmem:[%s4107_s25 + $0x158] sm:$0xff]  ;;  %v350_v47 = vld [vmem:[%s4107_s25 + $0x160] sm:$0xff] }
  0x29   : > { %3533 = vmatprep.mubr.msk.f32.mxu0 %vm371_vm1, %v314_v10  ;;  %v351_v48 = vld [vmem:[%s4107_s25 + $0x168] sm:$0xff]  ;;  %v352_v50 = vld [vmem:[%s4107_s25 + $0x170] sm:$0xff]  ;;  %v353_v51 = vld [vmem:[%s4107_s25 + $0x178] sm:$0xff] }
  0x2a   : > { %v354_v53 = vld [vmem:[%s4107_s25 + $0x180] sm:$0xff]  ;;  %v355_v54 = vld [vmem:[%s4107_s25 + $0x188] sm:$0xff]  ;;  %v356_v55 = vld [vmem:[%s4107_s25 + $0x190] sm:$0xff] }
  0x2b   : > { %v357_v56 = vld [vmem:[%s4107_s25 + $0x198] sm:$0xff]  ;;  %v358_v57 = vld [vmem:[%s4107_s25 + $0x1a0] sm:$0xff]  ;;  %v359_v58 = vld [vmem:[%s4107_s25 + $0x1a8] sm:$0xff] }
  0x2c   : > { %3534 = vmatmul.mubr.msk.f32.gmra.mxu0 %vm371_vm1, %v315_v11  ;;  %v360_v59 = vld [vmem:[%s4107_s25 + $0x1b0] sm:$0xff]  ;;  %v361_v60 = vld [vmem:[%s4107_s25 + $0x1b8] sm:$0xff] }
  0x2d   : > { %3536 = vmatprep.mubr.msk.f32.mxu0 %vm371_vm1, %v316_v12 }
  0x30   : > { %3537 = vmatmul.mubr.msk.f32.gmra.mxu0 %vm371_vm1, %v317_v13 }
  0x31   : > { %3539 = vmatprep.mubr.msk.f32.mxu0 %vm371_vm1, %v318_v14 }
  0x34   : > { %3540 = vmatmul.mubr.msk.f32.gmra.mxu0 %vm371_vm1, %v319_v15 }
  0x35   : > { %3542 = vmatprep.mubr.msk.f32.mxu0 %vm371_vm1, %v320_v16 }
  0x38   : > { %3543 = vmatmul.mubr.msk.f32.gmra.mxu0 %vm371_vm1, %v321_v17 }
  0x39   : > { %3545 = vmatprep.mubr.msk.f32.mxu0 %vm371_vm1, %v322_v18 }
  0x3c   : > { %3546 = vmatmul.mubr.msk.f32.gmra.mxu0 %vm371_vm1, %v323_v19 }
  0x3d   : > { %3548 = vmatprep.mubr.msk.f32.mxu0 %vm371_vm1, %v324_v20 }
  0x40   : > { %3549 = vmatmul.mubr.msk.f32.gmra.mxu0 %vm371_vm1, %v325_v21 }
  0x41   : > { %3551 = vmatprep.mubr.msk.f32.mxu0 %vm371_vm1, %v326_v22 }
  0x44   : > { %3552 = vmatmul.mubr.msk.f32.gmra.mxu0 %vm371_vm1, %v327_v23 }
  0x45   : > { %3554 = vmatprep.mubr.msk.f32.mxu0 %vm371_vm1, %v328_v24 }
  0x48   : > { %3555 = vmatmul.mubr.msk.f32.gmra.mxu0 %vm371_vm1, %v329_v25 }
  0x49   : > { %3557 = vmatprep.mubr.msk.f32.mxu0 %vm371_vm1, %v330_v26 }
  0x4c   : > { %3558 = vmatmul.mubr.msk.f32.gmra.mxu0 %vm371_vm1, %v331_v27 }
  0x4d   : > { %3560 = vmatprep.mubr.msk.f32.mxu0 %vm371_vm1, %v332_v28 }
  0x50   : > { %3561 = vmatmul.mubr.msk.f32.gmra.mxu0 %vm371_vm1, %v333_v29 }
  0x51   : > { %3563 = vmatprep.mubr.msk.f32.mxu0 %vm371_vm1, %v334_v30 }
  0x54   : > { %3564 = vmatmul.mubr.msk.f32.gmra.mxu0 %vm371_vm1, %v335_v31 }
  0x55   : > { %3566 = vmatprep.mubr.msk.f32.mxu0 %vm371_vm1, %v336_v32 }
  0x58   : > { %3567 = vmatmul.mubr.msk.f32.gmra.mxu0 %vm371_vm1, %v337_v33 }
  0x59   : > { %3569 = vmatprep.mubr.msk.f32.mxu0 %vm371_vm1, %v338_v34 }
  0x5c   : > { %3570 = vmatmul.mubr.msk.f32.gmra.mxu0 %vm371_vm1, %v339_v35 }
  0x5d   : > { %3572 = vmatprep.mubr.msk.f32.mxu0 %vm371_vm1, %v340_v36 }
  0x60   : > { %3573 = vmatmul.mubr.msk.f32.gmra.mxu0 %vm371_vm1, %v341_v37 }
  0x61   : > { %3575 = vmatprep.mubr.msk.f32.mxu0 %vm371_vm1, %v342_v38 }
  0x64   : > { %3576 = vmatmul.mubr.msk.f32.gmra.mxu0 %vm371_vm1, %v343_v39 }
  0x65   : > { %3578 = vmatprep.mubr.msk.f32.mxu0 %vm371_vm1, %v344_v40 }
  0x68   : > { %3579 = vmatmul.mubr.msk.f32.gmra.mxu0 %vm371_vm1, %v345_v41 }
  0x69   : > { %3581 = vmatprep.mubr.msk.f32.mxu0 %vm371_vm1, %v346_v42 }
  0x6c   : > { %3582 = vmatmul.mubr.msk.f32.gmra.mxu0 %vm371_vm1, %v347_v43 }
  0x6d   : > { %3584 = vmatprep.mubr.msk.f32.mxu0 %vm371_vm1, %v348_v44 }
  0x70   : > { %3585 = vmatmul.mubr.msk.f32.gmra.mxu0 %vm371_vm1, %v349_v46 }
  0x71   : > { %3587 = vmatprep.mubr.msk.f32.mxu0 %vm371_vm1, %v350_v47 }
  0x74   : > { %3588 = vmatmul.mubr.msk.f32.gmra.mxu0 %vm371_vm1, %v351_v48 }
  0x75   : > { %3590 = vmatprep.mubr.msk.f32.mxu0 %vm371_vm1, %v352_v50 }
  0x78   : > { %3591 = vmatmul.mubr.msk.f32.gmra.mxu0 %vm371_vm1, %v353_v51 }
  0x79   : > { %3593 = vmatprep.mubr.msk.f32.mxu0 %vm371_vm1, %v354_v53  ;;  %v3924_v53 = vld [vmem:[%s5430_s3 + $0x30] sm:$0xff]  }
  0x7c   : > { %3594 = vmatmul.mubr.msk.f32.gmra.mxu0 %vm371_vm1, %v355_v54 }
  0x7d   : > { %3596 = vmatprep.mubr.msk.f32.mxu0 %vm371_vm1, %v356_v55 }
  0x80   : > { %3597 = vmatmul.mubr.msk.f32.gmra.mxu0 %vm371_vm1, %v357_v56 }
  0x81   : > { %3599 = vmatprep.mubr.msk.f32.mxu0 %vm371_vm1, %v358_v57 }
  0x84   : > { %3600 = vmatmul.mubr.msk.f32.gmra.mxu0 %vm371_vm1, %v359_v58 }
  0x85   : > { %3602 = vmatprep.mubr.msk.f32.mxu0 %vm371_vm1, %v360_v59 }
  0x88   : > { %3603 = vmatmul.mubr.msk.f32.gmra.mxu0 %vm371_vm1, %v361_v60 }
  0xdc   : > { %v3523_v63 = vpop.f32.mrf.mxu0 }
  0xdd   : > { %v616_v0 = vadd.f32 %v3523_v63, %v4242_v62 }
  0xde   : > { %v610_v1 = vpop.f32.mrf.mxu0 }
  0xdf   : > { %v611_v2 = vadd.f32 %v4242_v62, %v610_v1  ;;  %v890_v4 = vmax.f32 %v616_v0, 0.0 }
  0xe0   : > { %v3526_v3 = vpop.f32.mrf.mxu0 }
  0xe1   : > { %v889_v5 = vmax.f32 %v611_v2, 0.0  ;;  %v626_v6 = vadd.f32 %v3526_v3, %v4242_v62  ;;  %v3927_v3 = vld [vmem:[%s5430_s3 + $0x58] sm:$0xff]  }
  0xe2   : > { %v620_v7 = vpop.f32.mrf.mxu0 }
  0xe3   : > { %v4247_v8 = vpack.c.bf16 %v890_v4, %v889_v5  ;;  %v621_v9 = vadd.f32 %v4242_v62, %v620_v7  ;;  %v892_v11 = vmax.f32 %v626_v6, 0.0 }
  0xe4   : > { %v3529_v10 = vpop.f32.mrf.mxu0 }
  0xe5   : > { %v891_v12 = vmax.f32 %v621_v9, 0.0  ;;  %v636_v13 = vadd.f32 %v3529_v10, %v4242_v62  ;;  %v981_v14 = vshll.u32 %v4247_v8, 16  ;;  %v979_v20 = vshrl.u32 %v4247_v8, 16 }
  0xe6   : > { %v630_v15 = vpop.f32.mrf.mxu0 }
  0xe7   : > { %v4252_v16 = vpack.c.bf16 %v892_v11, %v891_v12  ;;  %v631_v17 = vadd.f32 %v4242_v62, %v630_v15  ;;  %v983_v18 = vrot.slane %v981_v14, 1  ;;  %v894_v22 = vmax.f32 %v636_v13, 0.0  ;;  %v3928_v14 = vld [vmem:[%s5430_s3 + $0x50] sm:$0xff]  }
  0xe8   : > { %v3532_v19 = vpop.f32.mrf.mxu0 }
  0xe9   : > { %v986_v21 = vshll.u32 %v4252_v16, 16  ;;  %v893_v23 = vmax.f32 %v631_v17, 0.0  ;;  %v646_v24 = vadd.f32 %v3532_v19, %v4242_v62  ;;  %v984_v29 = vor.u32 %v983_v18, %v979_v20 }
  0xea   : > { %v640_v25 = vpop.f32.mrf.mxu0 }
  0xeb   : > { %v988_v26 = vrot.slane %v986_v21, 1  ;;  %v4258_v27 = vpack.c.bf16 %v894_v22, %v893_v23  ;;  %v641_v28 = vadd.f32 %v4242_v62, %v640_v25  ;;  %v896_v31 = vmax.f32 %v646_v24, 0.0 }
  0xec   : > { %v3535_v30 = vpop.f32.mrf.mxu0 }
  0xed   : > { %v895_v32 = vmax.f32 %v641_v28, 0.0  ;;  %v656_v33 = vadd.f32 %v3535_v30, %v4242_v62  ;;  %v989_v34 = vsel %vm977_vm2, %v984_v29, %v988_v26  ;;  %v993_v36 = vshll.u32 %v4258_v27, 16  ;;  %v4320_v28 = vld [vmem:[%s5430_s3 + $0x78] sm:$0xff]  }
  0xee   : > { %v650_v35 = vpop.f32.mrf.mxu0  ;;  %3609 = vmatprep.mubr.msk.bf16.mxu0 %vm1139_vm3, %v989_v34  ;;  %v991_v40 = vshrl.u32 %v4258_v27, 16 }
  0xef   : > { %v4265_v37 = vpack.c.bf16 %v896_v31, %v895_v32  ;;  %v651_v38 = vadd.f32 %v4242_v62, %v650_v35  ;;  %v995_v41 = vrot.slane %v993_v36, 1  ;;  %v898_v43 = vmax.f32 %v656_v33, 0.0 }
  0xf0   : > { %v3538_v39 = vpop.f32.mrf.mxu0 }
  0xf1   : > { %v998_v42 = vshll.u32 %v4265_v37, 16  ;;  %v897_v44 = vmax.f32 %v651_v38, 0.0  ;;  %v666_v45 = vadd.f32 %v3538_v39, %v4242_v62  ;;  %v996_v50 = vor.u32 %v995_v41, %v991_v40  ;;  %v3926_v40 = vld [vmem:[%s5430_s3] sm:$0xff]  }
  0xf2   : > { %v660_v46 = vpop.f32.mrf.mxu0 }
  0xf3   : > { %v1000_v47 = vrot.slane %v998_v42, 1  ;;  %v4271_v48 = vpack.c.bf16 %v898_v43, %v897_v44  ;;  %v661_v49 = vadd.f32 %v4242_v62, %v660_v46  ;;  %v900_v54 = vmax.f32 %v666_v45, 0.0 }
  0xf4   : > { %v3541_v51 = vpop.f32.mrf.mxu0 }
  0xf5   : > { %v899_v55 = vmax.f32 %v661_v49, 0.0  ;;  %v676_v56 = vadd.f32 %v3541_v51, %v4242_v62  ;;  %v4279_v57 = vsel %vm977_vm2, %v996_v50, %v1000_v47  ;;  %v1005_v59 = vshll.u32 %v4271_v48, 16 }
  0xf6   : > { %v670_v58 = vpop.f32.mrf.mxu0  ;;  %3610 = vmatmul.mubr.msk.bf16.vlgmr.msra.gmra.mxu0 %vm1139_vm3, %v4279_v57  ;;  %v1003_v1 = vshrl.u32 %v4271_v48, 16 }
  0xf7   : > { %v4284_v60 = vpack.c.bf16 %v900_v54, %v899_v55  ;;  %v671_v63 = vadd.f32 %v4242_v62, %v670_v58  ;;  %3690 = vmatpush3.bf16.msra.mxu0 %v4213_v52  ;;  %3693 = vmatprep.mubr.msk.bf16.mxu0 %vm1139_vm3, %v4258_v27  ;;  %v1007_v2 = vrot.slane %v1005_v59, 1  ;;  %v902_v5 = vmax.f32 %v676_v56, 0.0  ;;  %v4348_v54 = vld [vmem:[%s5430_s3 + $0x28] sm:$0xff]  }
  0xf8   : > { %v3544_v0 = vpop.f32.mrf.mxu0  ;;  %3691 = vmatprep.subr.bf16.mxu0 %v3924_v53 }
  0xf9   : > { %v1010_v4 = vshll.u32 %v4284_v60, 16  ;;  %v901_v6 = vmax.f32 %v671_v63, 0.0  ;;  %v686_v7 = vadd.f32 %v3544_v0, %v4242_v62  ;;  %v1008_v11 = vor.u32 %v1007_v2, %v1003_v1 }
  0xfa   : > { %v680_v9 = vpop.f32.mrf.mxu0 }
  0xfb   : > { %v4296_v52 = vpack.c.bf16 %v902_v5, %v901_v6  ;;  %v681_v10 = vadd.f32 %v4242_v62, %v680_v9  ;;  %3692 = vmatpush3.bf16.msra.mxu0 %v3924_v53  ;;  %v1012_v12 = vrot.slane %v1010_v4, 1  ;;  %v904_v15 = vmax.f32 %v686_v7, 0.0 }
  0xfc   : > { %v3547_v13 = vpop.f32.mrf.mxu0  ;;  %3745 = vmatprep.subr.bf16.mxu0 %v3927_v3 }
  0xfd   : > { %v903_v17 = vmax.f32 %v681_v10, 0.0  ;;  %v696_v18 = vadd.f32 %v3547_v13, %v4242_v62  ;;  %v4304_v19 = vsel %vm977_vm2, %v1008_v11, %v1012_v12  ;;  %v1017_v21 = vshll.u32 %v4296_v52, 16 }
  0xfe   : > { %v690_v20 = vpop.f32.mrf.mxu0  ;;  %3613 = vmatprep.mubr.msk.bf16.mxu1 %vm1139_vm3, %v4304_v19  ;;  %3694 = vmatmul.mubr.msk.bf16.vlgmr.msra.gmra.mxu0 %vm1139_vm3, %v4271_v48  ;;  %v1015_v25 = vshrl.u32 %v4296_v52, 16 }
  0xff   : > { %v4311_v22 = vpack.c.bf16 %v904_v15, %v903_v17  ;;  %v691_v23 = vadd.f32 %v4242_v62, %v690_v20  ;;  %3697 = vmatprep.mubr.msk.bf16.mxu0 %vm1139_vm3, %v4296_v52  ;;  %3746 = vmatpush3.bf16.msra.mxu0 %v3927_v3  ;;  %v1019_v26 = vrot.slane %v1017_v21, 1  ;;  %v906_v30 = vmax.f32 %v696_v18, 0.0 }
 0x100   : > { %v3550_v24 = vpop.f32.mrf.mxu0  ;;  %3747 = vmatprep.subr.bf16.mxu0 %v3928_v14 }
 0x101   : > { %v1022_v29 = vshll.u32 %v4311_v22, 16  ;;  %v905_v31 = vmax.f32 %v691_v23, 0.0  ;;  %v706_v32 = vadd.f32 %v3550_v24, %v4242_v62  ;;  %v1020_v38 = vor.u32 %v1019_v26, %v1015_v25 }
 0x102   : > { %v700_v33 = vpop.f32.mrf.mxu0 }
 0x103   : > { %v1024_v34 = vrot.slane %v1022_v29, 1  ;;  %v4324_v35 = vpack.c.bf16 %v906_v30, %v905_v31  ;;  %v701_v36 = vadd.f32 %v4242_v62, %v700_v33  ;;  %3748 = vmatpush3.bf16.msra.mxu0 %v3928_v14  ;;  %v908_v41 = vmax.f32 %v706_v32, 0.0 }
 0x104   : > { %v3553_v39 = vpop.f32.mrf.mxu0  ;;  %3801 = vmatprep.subr.bf16.mxu0 %v4320_v28 }
 0x105   : > { %v907_v42 = vmax.f32 %v701_v36, 0.0  ;;  %v716_v43 = vadd.f32 %v3553_v39, %v4242_v62  ;;  %v4333_v44 = vsel %vm977_vm2, %v1020_v38, %v1024_v34  ;;  %v1029_v46 = vshll.u32 %v4324_v35, 16 }
 0x106   : > { %v710_v45 = vpop.f32.mrf.mxu0  ;;  %3614 = vmatmul.mubr.msk.bf16.vlgmr.msra.gmra.mxu1 %vm1139_vm3, %v4333_v44  ;;  %3698 = vmatmul.mubr.msk.bf16.gmra.mxu0 %vm1139_vm3, %v4324_v35  ;;  %v1027_v51 = vshrl.u32 %v4324_v35, 16 }
 0x107   : > { %v4340_v47 = vpack.c.bf16 %v908_v41, %v907_v42  ;;  %v711_v49 = vadd.f32 %v4242_v62, %v710_v45  ;;  %3634 = vmatpush3.bf16.msra.mxu1 %v4236_v61  ;;  %v1031_v53 = vrot.slane %v1029_v46, 1  ;;  %v910_v56 = vmax.f32 %v716_v43, 0.0 }
 0x108   : > { %v3556_v50 = vpop.f32.mrf.mxu0  ;;  %3635 = vmatprep.subr.bf16.mxu1 %v3926_v40 }
 0x109   : > { %v1034_v55 = vshll.u32 %v4340_v47, 16  ;;  %v909_v58 = vmax.f32 %v711_v49, 0.0  ;;  %v726_v59 = vadd.f32 %v3556_v50, %v4242_v62  ;;  %v1032_v2 = vor.u32 %v1031_v53, %v1027_v51 }
 0x10a   : > { %v720_v63 = vpop.f32.mrf.mxu0 }
 0x10b   : > { %v1036_v0 = vrot.slane %v1034_v55, 1  ;;  %v4352_v1 = vpack.c.bf16 %v910_v56, %v909_v58  ;;  %v721_v61 = vadd.f32 %v4242_v62, %v720_v63  ;;  %3636 = vmatpush3.bf16.msra.mxu1 %v3926_v40  ;;  %v912_v4 = vmax.f32 %v726_v59, 0.0 }
 0x10c   : > { %v3559_v3 = vpop.f32.mrf.mxu0  ;;  %3661 = vmatprep.subr.bf16.mxu1 %v4348_v54 }
 0x10d   : > { %v911_v5 = vmax.f32 %v721_v61, 0.0  ;;  %v736_v6 = vadd.f32 %v3559_v3, %v4242_v62  ;;  %3701 = vmatprep.mubr.msk.bf16.mxu0 %vm1139_vm3, %v4352_v1  ;;  %v4360_v7 = vsel %vm977_vm2, %v1032_v2, %v1036_v0  ;;  %v1041_v10 = vshll.u32 %v4352_v1, 16 }
 0x10e   : > { %v730_v9 = vpop.f32.mrf.mxu0  ;;  %3617 = vmatprep.mubr.msk.bf16.mxu1 %vm1139_vm3, %v4360_v7  ;;  %v1039_v14 = vshrl.u32 %v4352_v1, 16 }
 0x10f   : > { %v4365_v11 = vpack.c.bf16 %v912_v4, %v911_v5  ;;  %v731_v12 = vadd.f32 %v4242_v62, %v730_v9  ;;  %v1043_v15 = vrot.slane %v1041_v10, 1  ;;  %v914_v18 = vmax.f32 %v736_v6, 0.0 }
 0x110   : > { %v3562_v13 = vpop.f32.mrf.mxu0 }
 0x111   : > { %v1046_v17 = vshll.u32 %v4365_v11, 16  ;;  %v913_v20 = vmax.f32 %v731_v12, 0.0  ;;  %v746_v21 = vadd.f32 %v3562_v13, %v4242_v62  ;;  %v1044_v29 = vor.u32 %v1043_v15, %v1039_v14 }
 0x112   : > { %v740_v23 = vpop.f32.mrf.mxu0 }
 0x113   : > { %v1048_v24 = vrot.slane %v1046_v17, 1  ;;  %v4371_v25 = vpack.c.bf16 %v914_v18, %v913_v20  ;;  %v741_v26 = vadd.f32 %v4242_v62, %v740_v23  ;;  %v916_v31 = vmax.f32 %v746_v21, 0.0 }
 0x114   : > { %v3565_v30 = vpop.f32.mrf.mxu0 }
 0x115   : > { %v915_v32 = vmax.f32 %v741_v26, 0.0  ;;  %v756_v33 = vadd.f32 %v3565_v30, %v4242_v62  ;;  %3702 = vmatmul.mubr.msk.bf16.gmra.mxu0 %vm1139_vm3, %v4371_v25  ;;  %v4378_v34 = vsel %vm977_vm2, %v1044_v29, %v1048_v24  ;;  %v1053_v38 = vshll.u32 %v4371_v25, 16 }
 0x116   : > { %v750_v36 = vpop.f32.mrf.mxu0  ;;  %3618 = vmatmul.mubr.msk.bf16.gmra.mxu1 %vm1139_vm3, %v4378_v34  ;;  %v1051_v42 = vshrl.u32 %v4371_v25, 16 }
 0x117   : > { %v4383_v39 = vpack.c.bf16 %v916_v31, %v915_v32  ;;  %v751_v40 = vadd.f32 %v4242_v62, %v750_v36  ;;  %v1055_v43 = vrot.slane %v1053_v38, 1  ;;  %v918_v46 = vmax.f32 %v756_v33, 0.0 }
 0x118   : > { %v3568_v41 = vpop.f32.mrf.mxu0 }
 0x119   : > { %v1058_v45 = vshll.u32 %v4383_v39, 16  ;;  %v917_v49 = vmax.f32 %v751_v40, 0.0  ;;  %v766_v50 = vadd.f32 %v3568_v41, %v4242_v62  ;;  %v1056_v58 = vor.u32 %v1055_v43, %v1051_v42 }
 0x11a   : > { %v760_v51 = vpop.f32.mrf.mxu0 }
 0x11b   : > { %v1060_v53 = vrot.slane %v1058_v45, 1  ;;  %v4389_v55 = vpack.c.bf16 %v918_v46, %v917_v49  ;;  %v761_v56 = vadd.f32 %v4242_v62, %v760_v51  ;;  %v920_v63 = vmax.f32 %v766_v50, 0.0 }
 0x11c   : > { %v3571_v59 = vpop.f32.mrf.mxu0 }
 0x11d   : > { %v919_v0 = vmax.f32 %v761_v56, 0.0  ;;  %v776_v61 = vadd.f32 %v3571_v59, %v4242_v62  ;;  %3705 = vmatprep.mubr.msk.bf16.mxu0 %vm1139_vm3, %v4389_v55  ;;  %v4396_v2 = vsel %vm977_vm2, %v1056_v58, %v1060_v53  ;;  %v1065_v4 = vshll.u32 %v4389_v55, 16 }
 0x11e   : > { %v770_v3 = vpop.f32.mrf.mxu0  ;;  %3621 = vmatprep.mubr.msk.bf16.mxu1 %vm1139_vm3, %v4396_v2  ;;  %v1063_v10 = vshrl.u32 %v4389_v55, 16 }
 0x11f   : > { %v4401_v5 = vpack.c.bf16 %v920_v63, %v919_v0  ;;  %v771_v6 = vadd.f32 %v4242_v62, %v770_v3  ;;  %v1067_v12 = vrot.slane %v1065_v4, 1  ;;  %v922_v14 = vmax.f32 %v776_v61, 0.0 }
 0x120   : > { %v3574_v9 = vpop.f32.mrf.mxu0 }
 0x121   : > { %v1070_v13 = vshll.u32 %v4401_v5, 16  ;;  %v921_v15 = vmax.f32 %v771_v6, 0.0  ;;  %v786_v17 = vadd.f32 %v3574_v9, %v4242_v62  ;;  %v1068_v24 = vor.u32 %v1067_v12, %v1063_v10 }
 0x122   : > { %v780_v18 = vpop.f32.mrf.mxu0 }
 0x123   : > { %v1072_v20 = vrot.slane %v1070_v13, 1  ;;  %v4407_v21 = vpack.c.bf16 %v922_v14, %v921_v15  ;;  %v781_v23 = vadd.f32 %v4242_v62, %v780_v18  ;;  %v924_v29 = vmax.f32 %v786_v17, 0.0 }
 0x124   : > { %v3577_v26 = vpop.f32.mrf.mxu0 }
 0x125   : > { %v923_v30 = vmax.f32 %v781_v23, 0.0  ;;  %v796_v31 = vadd.f32 %v3577_v26, %v4242_v62  ;;  %3706 = vmatmul.mubr.msk.bf16.gmra.mxu0 %vm1139_vm3, %v4407_v21  ;;  %v4414_v32 = vsel %vm977_vm2, %v1068_v24, %v1072_v20  ;;  %v1077_v36 = vshll.u32 %v4407_v21, 16 }
 0x126   : > { %v790_v33 = vpop.f32.mrf.mxu0  ;;  %3622 = vmatmul.mubr.msk.bf16.gmra.mxu1 %vm1139_vm3, %v4414_v32  ;;  %v1075_v42 = vshrl.u32 %v4407_v21, 16 }
 0x127   : > { %v4419_v38 = vpack.c.bf16 %v924_v29, %v923_v30  ;;  %v791_v40 = vadd.f32 %v4242_v62, %v790_v33  ;;  %v1079_v43 = vrot.slane %v1077_v36, 1  ;;  %v926_v46 = vmax.f32 %v796_v31, 0.0 }
 0x128   : > { %v3580_v41 = vpop.f32.mrf.mxu0 }
 0x129   : > { %v1082_v45 = vshll.u32 %v4419_v38, 16  ;;  %v925_v49 = vmax.f32 %v791_v40, 0.0  ;;  %v806_v50 = vadd.f32 %v3580_v41, %v4242_v62  ;;  %v1080_v59 = vor.u32 %v1079_v43, %v1075_v42 }
 0x12a   : > { %v800_v51 = vpop.f32.mrf.mxu0 }
 0x12b   : > { %v1084_v53 = vrot.slane %v1082_v45, 1  ;;  %v4425_v56 = vpack.c.bf16 %v926_v46, %v925_v49  ;;  %v801_v58 = vadd.f32 %v4242_v62, %v800_v51  ;;  %v928_v0 = vmax.f32 %v806_v50, 0.0 }
 0x12c   : > { %v3583_v63 = vpop.f32.mrf.mxu0 }
 0x12d   : > { %v927_v61 = vmax.f32 %v801_v58, 0.0  ;;  %v816_v3 = vadd.f32 %v3583_v63, %v4242_v62  ;;  %3709 = vmatprep.mubr.msk.bf16.mxu0 %vm1139_vm3, %v4425_v56  ;;  %v4432_v4 = vsel %vm977_vm2, %v1080_v59, %v1084_v53  ;;  %v1089_v9 = vshll.u32 %v4425_v56, 16 }
 0x12e   : > { %v810_v6 = vpop.f32.mrf.mxu0  ;;  %3625 = vmatprep.mubr.msk.bf16.mxu1 %vm1139_vm3, %v4432_v4  ;;  %v1087_v14 = vshrl.u32 %v4425_v56, 16 }
 0x12f   : > { %v4437_v10 = vpack.c.bf16 %v928_v0, %v927_v61  ;;  %v811_v12 = vadd.f32 %v4242_v62, %v810_v6  ;;  %v1091_v15 = vrot.slane %v1089_v9, 1  ;;  %v930_v18 = vmax.f32 %v816_v3, 0.0 }
 0x130   : > { %v3586_v13 = vpop.f32.mrf.mxu0 }
 0x131   : > { %v1094_v17 = vshll.u32 %v4437_v10, 16  ;;  %v929_v20 = vmax.f32 %v811_v12, 0.0  ;;  %v826_v23 = vadd.f32 %v3586_v13, %v4242_v62  ;;  %v1092_v31 = vor.u32 %v1091_v15, %v1087_v14 }
 0x132   : > { %v820_v24 = vpop.f32.mrf.mxu0 }
 0x133   : > { %v1096_v26 = vrot.slane %v1094_v17, 1  ;;  %v4443_v29 = vpack.c.bf16 %v930_v18, %v929_v20  ;;  %v821_v30 = vadd.f32 %v4242_v62, %v820_v24  ;;  %v932_v36 = vmax.f32 %v826_v23, 0.0 }
 0x134   : > { %v3589_v33 = vpop.f32.mrf.mxu0 }
 0x135   : > { %v931_v40 = vmax.f32 %v821_v30, 0.0  ;;  %v836_v41 = vadd.f32 %v3589_v33, %v4242_v62  ;;  %3710 = vmatmul.mubr.msk.bf16.gmra.mxu0 %vm1139_vm3, %v4443_v29  ;;  %v4450_v42 = vsel %vm977_vm2, %v1092_v31, %v1096_v26  ;;  %v1101_v45 = vshll.u32 %v4443_v29, 16 }
 0x136   : > { %v830_v43 = vpop.f32.mrf.mxu0  ;;  %3626 = vmatmul.mubr.msk.bf16.gmra.mxu1 %vm1139_vm3, %v4450_v42  ;;  %v1099_v51 = vshrl.u32 %v4443_v29, 16  ;;  %v1499_v33 = vrot.slane %v4265_v37, 1 }
 0x137   : > { %v4455_v46 = vpack.c.bf16 %v932_v36, %v931_v40  ;;  %v831_v49 = vadd.f32 %v4242_v62, %v830_v43  ;;  %v1103_v53 = vrot.slane %v1101_v45, 1  ;;  %v934_v59 = vmax.f32 %v836_v41, 0.0 }
 0x138   : > { %v3592_v50 = vpop.f32.mrf.mxu0 }
 0x139   : > { %v1106_v58 = vshll.u32 %v4455_v46, 16  ;;  %v933_v63 = vmax.f32 %v831_v49, 0.0  ;;  %v846_v0 = vadd.f32 %v3592_v50, %v4242_v62  ;;  %v1104_v12 = vor.u32 %v1103_v53, %v1099_v51 }
 0x13a   : > { %v840_v61 = vpop.f32.mrf.mxu0  ;;  %v1498_v50 = vrot.slane %v4258_v27, 1  ;;  %v1502_v53 = vrot.slane %v4284_v60, 1  ;;  %v3932_v60 = vld [vmem:[%s5430_s3 + $0x70] sm:$0xff]  }
 0x13b   : > { %v1108_v3 = vrot.slane %v1106_v58, 1  ;;  %v4461_v6 = vpack.c.bf16 %v934_v59, %v933_v63  ;;  %v841_v9 = vadd.f32 %v4242_v62, %v840_v61  ;;  %v936_v14 = vmax.f32 %v846_v0, 0.0  ;;  %v3930_v61 = vld [vmem:[%s5430_s3 + $0x20] sm:$0xff]  }
 0x13c   : > { %v3595_v13 = vpop.f32.mrf.mxu0  ;;  %v4488_v37 = vsel %vm1494_vm4, %v1498_v50, %v1499_v33  ;;  %v1505_v58 = vrot.slane %v4311_v22, 1  ;;  %v1501_v59 = vrot.slane %v4271_v48, 1  ;;  %v1504_v63 = vrot.slane %v4296_v52, 1 }
 0x13d   : > { %v935_v15 = vmax.f32 %v841_v9, 0.0  ;;  %v856_v17 = vadd.f32 %v3595_v13, %v4242_v62  ;;  %3713 = vmatprep.mubr.msk.bf16.mxu0 %vm1139_vm3, %v4461_v6  ;;  %v4468_v18 = vsel %vm977_vm2, %v1104_v12, %v1108_v3  ;;  %v1113_v23 = vshll.u32 %v4461_v6, 16  ;;  %v4526_v9 = vld [vmem:[%s5430_s3 + $0x48] sm:$0xff]  }
 0x13e   : > { %v850_v20 = vpop.f32.mrf.mxu0  ;;  %3629 = vmatprep.mubr.msk.bf16.mxu1 %vm1139_vm3, %v4468_v18  ;;  %v1111_v41 = vshrl.u32 %v4461_v6, 16  ;;  %v4501_v0 = vsel %vm1494_vm4, %v1501_v59, %v1502_v53  ;;  %v4509_v3 = vsel %vm1494_vm4, %v1504_v63, %v1505_v58  ;;  %v1508_v22 = vrot.slane %v4340_v47, 1 }
 0x13f   : > { %v4473_v24 = vpack.c.bf16 %v936_v14, %v935_v15  ;;  %v938_v26 = vmax.f32 %v856_v17, 0.0  ;;  %v851_v30 = vadd.f32 %v4242_v62, %v850_v20  ;;  %v1115_v31 = vrot.slane %v1113_v23, 1 }
 0x140   : > { %v1507_v12 = vrot.slane %v4324_v35, 1  ;;  %v1510_v13 = vrot.slane %v4352_v1, 1  ;;  %v1514_v47 = vrot.slane %v4383_v39, 1  ;;  %v1513_v14 = vrot.slane %v4371_v25, 1  ;;  %v3598_v17 = vpop.f32.mrf.mxu0 }
 0x141   : > { %v1118_v36 = vshll.u32 %v4473_v24, 16  ;;  %v937_v40 = vmax.f32 %v851_v30, 0.0  ;;  %v1116_v49 = vor.u32 %v1115_v31, %v1111_v41  ;;  %v1516_v15 = vrot.slane %v4389_v55, 1 }
 0x142   : > { %v4551_v20 = vsel %vm1494_vm4, %v1513_v14, %v1514_v47  ;;  %v860_v39 = vpop.f32.mrf.mxu0  ;;  %v1519_v30 = vrot.slane %v4407_v21, 1  ;;  %v866_v31 = vadd.f32 %v3598_v17, %v4242_v62  ;;  %v1525_v53 = vrot.slane %v4443_v29, 1 }
 0x143   : > { %v1120_v43 = vrot.slane %v1118_v36, 1  ;;  %v4479_v45 = vpack.c.bf16 %v938_v26, %v937_v40  ;;  %v1523_v26 = vrot.slane %v4437_v10, 1  ;;  %v861_v33 = vadd.f32 %v4242_v62, %v860_v39 }
 0x144   : > { %v1522_v36 = vrot.slane %v4425_v56, 1  ;;  %v1528_v58 = vrot.slane %v4461_v6, 1 }
 0x145   : > { %3714 = vmatmul.mubr.msk.bf16.gmra.mxu0 %vm1139_vm3, %v4479_v45  ;;  %v4485_v51 = vsel %vm977_vm2, %v1116_v49, %v1120_v43  ;;  %v939_v10 = vmax.f32 %v861_v33, 0.0  ;;  %v1526_v43 = vrot.slane %v4455_v46, 1  ;;  %v1529_v49 = vrot.slane %v4473_v24, 1 }
 0x146   : > { %3630 = vmatmul.mubr.msk.bf16.gmra.mxu1 %vm1139_vm3, %v4485_v51  ;;  %3749 = vmatprep.mubr.msk.bf16.mxu0 %vm1139_vm3, %v4488_v37  ;;  %v4576_v41 = vsel %vm1494_vm4, %v1522_v36, %v1523_v26  ;;  %v2096_v46 = vrot.slane %v4479_v45, 1  ;;  %v1496_v24 = vrot.slane %v4252_v16, 1  ;;  %v3934_v16 = vld [vmem:[%s5430_s3 + $0x40] sm:$0xff]   ;;  %v1910_v36 = vshrl.u32 %v4479_v45, 16 }
 0x147   : > { %3637 = vmatprep.mubr.msk.bf16.mxu1 %vm1139_vm3, %v4247_v8  ;;  %v4589_v59 = vsel %vm1494_vm4, %v1525_v53, %v1526_v43  ;;  %v4594_v63 = vsel %vm1494_vm4, %v1528_v58, %v1529_v49 }
 0x14d   : > { %3750 = vmatmul.mubr.msk.bf16.vlgmr.msra.gmra.mxu0 %vm1139_vm3, %v4501_v0 }
 0x14e   : > { %3638 = vmatmul.mubr.msk.bf16.vlgmr.msra.gmra.mxu1 %vm1139_vm3, %v4258_v27  ;;  %3753 = vmatprep.mubr.msk.bf16.mxu0 %vm1139_vm3, %v4509_v3  ;;  %v1511_v27 = vrot.slane %v4365_v11, 1  ;;  %v1517_v11 = vrot.slane %v4401_v5, 1  ;;  %v1520_v5 = vrot.slane %v4419_v38, 1  ;;  %v940_v38 = vmax.f32 %v866_v31, 0.0 }
 0x14f   : > { %3641 = vmatprep.mubr.msk.bf16.mxu1 %vm1139_vm3, %v4271_v48  ;;  %3662 = vmatpush3.bf16.msra.mxu1 %v4348_v54  ;;  %v4532_v54 = vsel %vm1494_vm4, %v1507_v12, %v1508_v22  ;;  %v1495_v22 = vrot.slane %v4247_v8, 1  ;;  %v3935_v8 = vld [vmem:[%s5430_s3 + $0x68] sm:$0xff]   ;;  %v3601_v12 = vpop.f32.mrf.mxu0 }
 0x150   : > { %3663 = vmatprep.subr.bf16.mxu1 %v3930_v61  ;;  %3802 = vmatpush3.bf16.msra.mxu0 %v4320_v28  ;;  %v4538_v28 = vsel %vm1494_vm4, %v1510_v13, %v1511_v27  ;;  %v4556_v23 = vsel %vm1494_vm4, %v1516_v15, %v1517_v11  ;;  %v4571_v40 = vsel %vm1494_vm4, %v1519_v30, %v1520_v5  ;;  %v1912_v5 = vshll.u32 %v4479_v45, 16 }
 0x151   : > { %3803 = vmatprep.subr.bf16.mxu0 %v3932_v60  ;;  %v970_v50 = vpack.c.bf16 %v940_v38, %v939_v10  ;;  %v1497_v27 = vsel %vm1494_vm4, %v1495_v22, %v1496_v24  ;;  %v876_v13 = vadd.f32 %v3601_v12, %v4242_v62 }
 0x152   : > { %v1914_v38 = vrot.slane %v1912_v5, 1 }
 0x153   : > { %3664 = vmatpush3.bf16.msra.mxu1 %v3930_v61  ;;  %v2097_v61 = vrot.slane %v970_v50, 1  ;;  %v942_v14 = vmax.f32 %v876_v13, 0.0  ;;  %v1917_v33 = vshll.u32 %v970_v50, 16 }
 0x154   : > { %3804 = vmatpush3.bf16.msra.mxu0 %v3932_v60  ;;  %3717 = vmatprep.subr.bf16.mxu1 %v4526_v9  ;;  %v1915_v49 = vor.u32 %v1914_v38, %v1910_v36 }
 0x155   : > { %3754 = vmatmul.mubr.msk.bf16.gmra.mxu0 %vm1139_vm3, %v4532_v54  ;;  %v4605_v60 = vsel %vm1494_vm4, %v2096_v46, %v2097_v61  ;;  %v1919_v43 = vrot.slane %v1917_v33, 1 }
 0x156   : > { %3642 = vmatmul.mubr.msk.bf16.gmra.mxu1 %vm1139_vm3, %v4296_v52  ;;  %3757 = vmatprep.mubr.msk.bf16.mxu0 %vm1139_vm3, %v4538_v28 }
 0x157   : > { %3645 = vmatprep.mubr.msk.bf16.mxu1 %vm1139_vm3, %v4324_v35  ;;  %v1920_v61 = vsel %vm977_vm2, %v1915_v49, %v1919_v43 }
 0x15d   : > { %3758 = vmatmul.mubr.msk.bf16.gmra.mxu0 %vm1139_vm3, %v4551_v20 }
 0x15e   : > { %3646 = vmatmul.mubr.msk.bf16.gmra.mxu1 %vm1139_vm3, %v4352_v1  ;;  %3761 = vmatprep.mubr.msk.bf16.mxu0 %vm1139_vm3, %v4556_v23 }
 0x15f   : > { %3649 = vmatprep.mubr.msk.bf16.mxu1 %vm1139_vm3, %v4371_v25 }
 0x165   : > { %3762 = vmatmul.mubr.msk.bf16.gmra.mxu0 %vm1139_vm3, %v4571_v40 }
 0x166   : > { %3650 = vmatmul.mubr.msk.bf16.gmra.mxu1 %vm1139_vm3, %v4389_v55  ;;  %3765 = vmatprep.mubr.msk.bf16.mxu0 %vm1139_vm3, %v4576_v41 }
 0x167   : > { %3653 = vmatprep.mubr.msk.bf16.mxu1 %vm1139_vm3, %v4407_v21 }
 0x16d   : > { %3766 = vmatmul.mubr.msk.bf16.gmra.mxu0 %vm1139_vm3, %v4589_v59 }
 0x16e   : > { %3654 = vmatmul.mubr.msk.bf16.gmra.mxu1 %vm1139_vm3, %v4425_v56  ;;  %3769 = vmatprep.mubr.msk.bf16.mxu0 %vm1139_vm3, %v4594_v63 }
 0x16f   : > { %3657 = vmatprep.mubr.msk.bf16.mxu1 %vm1139_vm3, %v4443_v29 }
 0x175   : > { %3770 = vmatmul.mubr.msk.bf16.gmra.mxu0 %vm1139_vm3, %v4605_v60 }
 0x176   : > { %3658 = vmatmul.mubr.msk.bf16.gmra.mxu1 %vm1139_vm3, %v4461_v6  ;;  %3805 = vmatprep.mubr.msk.bf16.mxu0 %vm1139_vm3, %v4304_v19 }
 0x177   : > { %3665 = vmatprep.mubr.msk.bf16.mxu1 %vm1139_vm3, %v1497_v27  ;;  %v3936_v27 = vld [vmem:[%s5430_s3 + $0x60] sm:$0xff]  }
 0x17d   : > { %3806 = vmatmul.mubr.msk.bf16.vlgmr.msra.gmra.mxu0 %vm1139_vm3, %v4333_v44 }
 0x17e   : > { %3666 = vmatmul.mubr.msk.bf16.vlgmr.msra.gmra.mxu1 %vm1139_vm3, %v4488_v37  ;;  %3809 = vmatprep.mubr.msk.bf16.mxu0 %vm1139_vm3, %v4360_v7  ;;  %v870_v37 = vpop.f32.mrf.mxu0 }
 0x17f   : > { %3669 = vmatprep.mubr.msk.bf16.mxu1 %vm1139_vm3, %v4501_v0  ;;  %3718 = vmatpush3.bf16.msra.mxu1 %v4526_v9  ;;  %v871_v47 = vadd.f32 %v4242_v62, %v870_v37 }
 0x180   : > { %3719 = vmatprep.subr.bf16.mxu1 %v3934_v16  ;;  %v3604_v9 = vpop.f32.mrf.mxu0 }
 0x181   : > { %v941_v15 = vmax.f32 %v871_v47, 0.0  ;;  %v886_v17 = vadd.f32 %v3604_v9, %v4242_v62 }
 0x182   : > { %v880_v11 = vpop.f32.mrf.mxu0 }
 0x183   : > { %3720 = vmatpush3.bf16.msra.mxu1 %v3934_v16  ;;  %v881_v39 = vadd.f32 %v4242_v62, %v880_v11  ;;  %v4652_v26 = vpack.c.bf16 %v942_v14, %v941_v15  ;;  %v944_v30 = vmax.f32 %v886_v17, 0.0  ;;  %v3937_v16 = vld [vmem:[%s5430_s3 + $0x88] sm:$0xff]  }
 0x184   : > { %3773 = vmatprep.subr.bf16.mxu1 %v3935_v8 }
 0x185   : > { %3810 = vmatmul.mubr.msk.bf16.gmra.mxu0 %vm1139_vm3, %v4378_v34  ;;  %v943_v31 = vmax.f32 %v881_v39, 0.0  ;;  %v2447_v62 = vshll.u32 %v4652_v26, 16  ;;  %v2445_v50 = vshrl.u32 %v4652_v26, 16 }
 0x186   : > { %3670 = vmatmul.mubr.msk.bf16.gmra.mxu1 %vm1139_vm3, %v4509_v3  ;;  %3813 = vmatprep.mubr.msk.bf16.mxu0 %vm1139_vm3, %v4396_v2 }
 0x187   : > { %3673 = vmatprep.mubr.msk.bf16.mxu1 %vm1139_vm3, %v4532_v54  ;;  %v4662_v10 = vpack.c.bf16 %v944_v30, %v943_v31  ;;  %v2449_v53 = vrot.slane %v2447_v62, 1 }
 0x189   : > { %v2452_v58 = vshll.u32 %v4662_v10, 16  ;;  %v2450_v24 = vor.u32 %v2449_v53, %v2445_v50 }
 0x18b   : > { %v2454_v46 = vrot.slane %v2452_v58, 1 }
 0x18d   : > { %3814 = vmatmul.mubr.msk.bf16.gmra.mxu0 %vm1139_vm3, %v4414_v32  ;;  %v2455_v22 = vsel %vm977_vm2, %v2450_v24, %v2454_v46 }
 0x18e   : > { %3674 = vmatmul.mubr.msk.bf16.gmra.mxu1 %vm1139_vm3, %v4538_v28  ;;  %3817 = vmatprep.mubr.msk.bf16.mxu0 %vm1139_vm3, %v4432_v4 }
 0x18f   : > { %3677 = vmatprep.mubr.msk.bf16.mxu1 %vm1139_vm3, %v4551_v20 }
 0x195   : > { %3818 = vmatmul.mubr.msk.bf16.gmra.mxu0 %vm1139_vm3, %v4450_v42 }
 0x196   : > { %3678 = vmatmul.mubr.msk.bf16.gmra.mxu1 %vm1139_vm3, %v4556_v23  ;;  %3821 = vmatprep.mubr.msk.bf16.mxu0 %vm1139_vm3, %v4468_v18 }
 0x197   : > { %3681 = vmatprep.mubr.msk.bf16.mxu1 %vm1139_vm3, %v4571_v40 }
 0x19d   : > { %3822 = vmatmul.mubr.msk.bf16.gmra.mxu0 %vm1139_vm3, %v4485_v51 }
 0x19e   : > { %3682 = vmatmul.mubr.msk.bf16.gmra.mxu1 %vm1139_vm3, %v4576_v41  ;;  %3825 = vmatprep.mubr.msk.bf16.mxu0 %vm1139_vm3, %v1920_v61 }
 0x19f   : > { %3685 = vmatprep.mubr.msk.bf16.mxu1 %vm1139_vm3, %v4589_v59 }
 0x1a5   : > { %3826 = vmatmul.mubr.msk.bf16.gmra.mxu0 %vm1139_vm3, %v2455_v22 }
 0x1a6   : > { %3686 = vmatmul.mubr.msk.bf16.gmra.mxu1 %vm1139_vm3, %v4594_v63 }
 0x1a7   : > { %3721 = vmatprep.mubr.msk.bf16.mxu1 %vm1139_vm3, %v4279_v57 }
 0x1ae   : > { %3722 = vmatmul.mubr.msk.bf16.vlgmr.msra.gmra.mxu1 %vm1139_vm3, %v4304_v19 }
 0x1af   : > { %3725 = vmatprep.mubr.msk.bf16.mxu1 %vm1139_vm3, %v4333_v44  ;;  %3774 = vmatpush3.bf16.msra.mxu1 %v3935_v8 }
 0x1b0   : > { %3775 = vmatprep.subr.bf16.mxu1 %v3936_v27 }
 0x1b3   : > { %3776 = vmatpush3.bf16.msra.mxu1 %v3936_v27 }
 0x1b4   : > { %3829 = vmatprep.subr.bf16.mxu1 %v3937_v16 }
 0x1b6   : > { %3726 = vmatmul.mubr.msk.bf16.gmra.mxu1 %vm1139_vm3, %v4360_v7 }
 0x1b7   : > { %3729 = vmatprep.mubr.msk.bf16.mxu1 %vm1139_vm3, %v4378_v34 }
 0x1be   : > { %3730 = vmatmul.mubr.msk.bf16.gmra.mxu1 %vm1139_vm3, %v4396_v2  ;;  %v3938_v2 = vld [vmem:[%s5430_s3 + $0x80] sm:$0xff]  }
 0x1bf   : > { %3733 = vmatprep.mubr.msk.bf16.mxu1 %vm1139_vm3, %v4414_v32 }
 0x1c6   : > { %3734 = vmatmul.mubr.msk.bf16.gmra.mxu1 %vm1139_vm3, %v4432_v4  ;;  %v4704_v57 = vpop.f32.mrf.mxu1  ;;  %v4732_v4 = vpop.f32.mrf.mxu0 }
 0x1c7   : > { %3737 = vmatprep.mubr.msk.bf16.mxu1 %vm1139_vm3, %v4450_v42 }
 0x1c8   : > { %v4710_v19 = vpop.f32.mrf.mxu1 }
 0x1ca   : > { %v4712_v44 = vpop.f32.mrf.mxu1 }
 0x1cc   : > { %v4717_v7 = vpop.f32.mrf.mxu1 }
 0x1ce   : > { %3738 = vmatmul.mubr.msk.bf16.gmra.mxu1 %vm1139_vm3, %v4468_v18 }
 0x1cf   : > { %3741 = vmatprep.mubr.msk.bf16.mxu1 %vm1139_vm3, %v4485_v51 }
 0x1d6   : > { %3742 = vmatmul.mubr.msk.bf16.gmra.mxu1 %vm1139_vm3, %v1920_v61  ;;  %v4719_v34 = vpop.f32.mrf.mxu1 }
 0x1d7   : > { %3777 = vmatprep.mubr.msk.bf16.mxu1 %vm1139_vm3, %v4271_v48 }
 0x1d8   : > { %v4728_v32 = vpop.f32.mrf.mxu1 }
 0x1da   : > { %v4730_v48 = vpop.f32.mrf.mxu1 }
 0x1dc   : > { %v1245_v42 = vpop.f32.mrf.mxu1 }
 0x1de   : > { %3778 = vmatmul.mubr.msk.bf16.vlgmr.msra.gmra.mxu1 %vm1139_vm3, %v4296_v52  ;;  %v4738_v52 = vpop.f32.mrf.mxu0 }
 0x1df   : > { %3781 = vmatprep.mubr.msk.bf16.mxu1 %vm1139_vm3, %v4324_v35  ;;  %3830 = vmatpush3.bf16.msra.mxu1 %v3937_v16 }
 0x1e0   : > { %3831 = vmatprep.subr.bf16.mxu1 %v3938_v2  ;;  %v4740_v35 = vpop.f32.mrf.mxu0 }
 0x1e2   : > { %v4746_v8 = vpop.f32.mrf.mxu0 }
 0x1e3   : > { %3832 = vmatpush3.bf16.msra.mxu1 %v3938_v2 }
 0x1e6   : > { %3782 = vmatmul.mubr.msk.bf16.gmra.mxu1 %vm1139_vm3, %v4352_v1  ;;  %v3623_v18 = vpop.f32.mrf.mxu1  ;;  %v4748_v1 = vpop.f32.mrf.mxu0 }
 0x1e7   : > { %3785 = vmatprep.mubr.msk.bf16.mxu1 %vm1139_vm3, %v4371_v25 }
 0x1e8   : > { %v1258_v51 = vpop.f32.mrf.mxu1  ;;  %v4754_v9 = vpop.f32.mrf.mxu0 }
 0x1ea   : > { %v3624_v12 = vpop.f32.mrf.mxu1 }
 0x1ec   : > { %v1261_v37 = vpop.f32.mrf.mxu1 }
 0x1ee   : > { %3786 = vmatmul.mubr.msk.bf16.gmra.mxu1 %vm1139_vm3, %v4389_v55  ;;  %v4756_v55 = vpop.f32.mrf.mxu0 }
 0x1ef   : > { %3789 = vmatprep.mubr.msk.bf16.mxu1 %vm1139_vm3, %v4407_v21 }
 0x1f0   : > { %v4762_v47 = vpop.f32.mrf.mxu0 }
 0x1f6   : > { %3790 = vmatmul.mubr.msk.bf16.gmra.mxu1 %vm1139_vm3, %v4425_v56  ;;  %v3627_v25 = vpop.f32.mrf.mxu1  ;;  %v4764_v56 = vpop.f32.mrf.mxu0 }
 0x1f7   : > { %3793 = vmatprep.mubr.msk.bf16.mxu1 %vm1139_vm3, %v4443_v29 }
 0x1f8   : > { %v1274_v13 = vpop.f32.mrf.mxu1 }
 0x1fa   : > { %v3628_v21 = vpop.f32.mrf.mxu1 }
 0x1fc   : > { %v1277_v11 = vpop.f32.mrf.mxu1 }
 0x1fe   : > { %3794 = vmatmul.mubr.msk.bf16.gmra.mxu1 %vm1139_vm3, %v4461_v6  ;;  %v4774_v6 = vpop.f32.mrf.mxu0 }
 0x1ff   : > { %3797 = vmatprep.mubr.msk.bf16.mxu1 %vm1139_vm3, %v4479_v45 }
 0x200   : > { %v4780_v17 = vpop.f32.mrf.mxu0 }
 0x206   : > { %v4766_v14 = vpop.f32.mrf.mxu1  ;;  %3798 = vmatmul.mubr.msk.bf16.gmra.mxu1 %vm1139_vm3, %v4652_v26 }
 0x207   : > { %3833 = vmatprep.mubr.msk.bf16.mxu1 %vm1139_vm3, %v4501_v0  ;;  %v4790_v0 = vpop.f32.mrf.mxu0 }
 0x208   : > { %v4772_v29 = vpop.f32.mrf.mxu1 }
 0x209   : > { %v4794_v31 = vpop.f32.mrf.mxu0 }
 0x20a   : > { %v4776_v15 = vpop.f32.mrf.mxu1 }
 0x20c   : > { %v4778_v45 = vpop.f32.mrf.mxu1 }
 0x20e   : > { %v4782_v39 = vpop.f32.mrf.mxu1  ;;  %3834 = vmatmul.mubr.msk.bf16.vlgmr.msra.gmra.mxu1 %vm1139_vm3, %v4509_v3  ;;  %v4804_v3 = vpop.f32.mrf.mxu0 }
 0x20f   : > { %3837 = vmatprep.mubr.msk.bf16.mxu1 %vm1139_vm3, %v4532_v54 }
 0x210   : > { %v4788_v5 = vpop.f32.mrf.mxu1  ;;  %v4810_v62 = vpop.f32.mrf.mxu0 }
 0x212   : > { %v4792_v30 = vpop.f32.mrf.mxu1 }
 0x214   : > { %v4796_v33 = vpop.f32.mrf.mxu1 }
 0x216   : > { %v4798_v36 = vpop.f32.mrf.mxu1  ;;  %3838 = vmatmul.mubr.msk.bf16.gmra.mxu1 %vm1139_vm3, %v4538_v28  ;;  %v4820_v28 = vpop.f32.mrf.mxu0 }
 0x217   : > { %3841 = vmatprep.mubr.msk.bf16.mxu1 %vm1139_vm3, %v4551_v20 }
 0x218   : > { %v4806_v54 = vpop.f32.mrf.mxu1  ;;  %v4824_v50 = vpop.f32.mrf.mxu0 }
 0x219   : > { %5440 = vst [vmem:[#allocation5_spill] sm:$0xff] %v4824_v50 }
 0x21a   : > { %v4808_v38 = vpop.f32.mrf.mxu1  ;;  %v4830_v46 = vpop.f32.mrf.mxu0 }
 0x21b   : > { %5441 = vst [vmem:[#allocation6_spill] sm:$0xff] %v4830_v46 }
 0x21c   : > { %v4812_v43 = vpop.f32.mrf.mxu1  ;;  %v4840_v27 = vpop.f32.mrf.mxu0 }
 0x21e   : > { %v4814_v49 = vpop.f32.mrf.mxu1  ;;  %3842 = vmatmul.mubr.msk.bf16.gmra.mxu1 %vm1139_vm3, %v4556_v23  ;;  %v4846_v46 = vpop.f32.mrf.mxu0 }
 0x21f   : > { %3845 = vmatprep.mubr.msk.bf16.mxu1 %vm1139_vm3, %v4571_v40 }
 0x220   : > { %v4822_v20 = vpop.f32.mrf.mxu1 }
 0x222   : > { %v4826_v53 = vpop.f32.mrf.mxu1 }
 0x224   : > { %v1410_v58 = vpop.f32.mrf.mxu1 }
 0x225   : > { %v4828_v61 = vadd.f32 %v1410_v58, %v1245_v42 }
 0x226   : > { %v3651_v24 = vpop.f32.mrf.mxu1  ;;  %3846 = vmatmul.mubr.msk.bf16.gmra.mxu1 %vm1139_vm3, %v4576_v41 }
 0x227   : > { %v4834_v23 = vadd.f32 %v3651_v24, %v3623_v18  ;;  %3849 = vmatprep.mubr.msk.bf16.mxu1 %vm1139_vm3, %v4589_v59  ;;  %v4854_v59 = vpop.f32.mrf.mxu0 }
 0x228   : > { %v1423_v40 = vpop.f32.mrf.mxu1 }
 0x229   : > { %v4838_v22 = vadd.f32 %v1423_v40, %v1258_v51  ;;  %v2632_v51 = vrot.slane %v4662_v10, 1 }
 0x22a   : > { %v3652_v16 = vpop.f32.mrf.mxu1 }
 0x22b   : > { %v4842_v2 = vadd.f32 %v3652_v16, %v3624_v12  ;;  %v4862_v16 = vpop.f32.mrf.mxu0 }
 0x22c   : > { %v1426_v42 = vpop.f32.mrf.mxu1 }
 0x22d   : > { %v4844_v58 = vadd.f32 %v1426_v42, %v1261_v37  ;;  %v2631_v37 = vrot.slane %v4652_v26, 1  ;;  %v4871_v10 = vpop.f32.mrf.mxu0 }
 0x22e   : > { %v3655_v50 = vpop.f32.mrf.mxu1  ;;  %3850 = vmatmul.mubr.msk.bf16.gmra.mxu1 %vm1139_vm3, %v4594_v63 }
 0x22f   : > { %v4850_v41 = vadd.f32 %v3655_v50, %v3627_v25  ;;  %3853 = vmatprep.mubr.msk.bf16.mxu1 %vm1139_vm3, %v4605_v60  ;;  %v2633_v50 = vsel %vm1494_vm4, %v2631_v37, %v2632_v51  ;;  %v1384_v51 = vadd.f32 %v4782_v39, %v4732_v4 }
 0x230   : > { %v1439_v18 = vpop.f32.mrf.mxu1 }
 0x231   : > { %v4857_v12 = vadd.f32 %v1439_v18, %v1274_v13 }
 0x232   : > { %v3656_v24 = vpop.f32.mrf.mxu1 }
 0x233   : > { %v4860_v40 = vadd.f32 %v3656_v24, %v3628_v21 }
 0x234   : > { %v1442_v63 = vpop.f32.mrf.mxu1 }
 0x235   : > { %v4864_v25 = vadd.f32 %v1442_v63, %v1277_v11  ;;  %v4879_v11 = vpop.f32.mrf.mxu0 }
 0x236   : > { %v3659_v60 = vpop.f32.mrf.mxu1  ;;  %3854 = vmatmul.mubr.msk.bf16.gmra.mxu1 %vm1139_vm3, %v2633_v50 }
 0x237   : > { %v4869_v42 = vadd.f32 %v3659_v60, %v4766_v14  ;;  %v4886_v14 = vpop.f32.mrf.mxu0 }
 0x238   : > { %v1455_v13 = vpop.f32.mrf.mxu1 }
 0x239   : > { %v4874_v26 = vadd.f32 %v1455_v13, %v4772_v29  ;;  %v1376_v29 = vadd.f32 %v4788_v5, %v4738_v52  ;;  %v1400_v52 = vadd.f32 %v4798_v36, %v4704_v57  ;;  %v1395_v57 = vadd.f32 %v4812_v43, %v4717_v7 }
 0x23a   : > { %v3660_v21 = vpop.f32.mrf.mxu1  ;;  %v1419_v7 = vadd.f32 %v4826_v53, %v4730_v48 }
 0x23b   : > { %v4877_v18 = vadd.f32 %v3660_v21, %v4776_v15  ;;  %v1387_v15 = vadd.f32 %v4792_v30, %v4740_v35  ;;  %v4896_v21 = vpop.f32.mrf.mxu0  ;;  %v1392_v35 = vadd.f32 %v4806_v54, %v4710_v19  ;;  %v1416_v19 = vadd.f32 %v4814_v49, %v4719_v34 }
 0x23c   : > { %v1458_v24 = vpop.f32.mrf.mxu1 }
 0x23d   : > { %v4884_v37 = vadd.f32 %v1458_v24, %v4778_v45  ;;  %v1379_v45 = vadd.f32 %v4796_v33, %v4746_v8  ;;  %v1403_v8 = vadd.f32 %v4808_v38, %v4712_v44  ;;  %v1408_v44 = vadd.f32 %v4822_v20, %v4728_v32 }
 0x23e   : > { %v3667_v63 = vpop.f32.mrf.mxu1 }
 0x23f   : > { %v4890_v50 = vadd.f32 %v3667_v63, %v1384_v51  ;;  %v4906_v51 = vpop.f32.mrf.mxu0 }
 0x240   : > { %v1618_v60 = vpop.f32.mrf.mxu1 }
 0x241   : > { %v4894_v13 = vadd.f32 %v1618_v60, %v1376_v29  ;;  %v4916_v60 = vpop.f32.mrf.mxu0 }
 0x242   : > { %v3668_v4 = vpop.f32.mrf.mxu1 }
 0x243   : > { %v4900_v39 = vadd.f32 %v3668_v4, %v1387_v15 }
 0x244   : > { %v1621_v24 = vpop.f32.mrf.mxu1 }
 0x245   : > { %v4904_v5 = vadd.f32 %v1621_v24, %v1379_v45  ;;  %v4926_v45 = vpop.f32.mrf.mxu0 }
 0x246   : > { %v3671_v63 = vpop.f32.mrf.mxu1 }
 0x247   : > { %v4910_v30 = vadd.f32 %v3671_v63, %v1400_v52  ;;  %v4936_v63 = vpop.f32.mrf.mxu0 }
 0x248   : > { %v1634_v29 = vpop.f32.mrf.mxu1 }
 0x249   : > { %v4914_v33 = vadd.f32 %v1634_v29, %v1392_v35 }
 0x24a   : > { %v3672_v15 = vpop.f32.mrf.mxu1 }
 0x24b   : > { %v4920_v36 = vadd.f32 %v3672_v15, %v1403_v8  ;;  %v4943_v8 = vpop.f32.mrf.mxu0 }
 0x24c   : > { %v1637_v4 = vpop.f32.mrf.mxu1 }
 0x24d   : > { %v4924_v54 = vadd.f32 %v1637_v4, %v1395_v57  ;;  %v4951_v53 = vpop.f32.mrf.mxu0 }
 0x24e   : > { %v3675_v24 = vpop.f32.mrf.mxu1 }
 0x24f   : > { %v4930_v38 = vadd.f32 %v3675_v24, %v1416_v19  ;;  %v4959_v24 = vpop.f32.mrf.mxu0 }
 0x250   : > { %v1650_v52 = vpop.f32.mrf.mxu1 }
 0x251   : > { %v4934_v43 = vadd.f32 %v1650_v52, %v1408_v44 }
 0x252   : > { %v3676_v35 = vpop.f32.mrf.mxu1 }
 0x253   : > { %v4938_v34 = vadd.f32 %v3676_v35, %v1419_v7  ;;  %v4967_v7 = vpop.f32.mrf.mxu0 }
 0x254   : > { %v1653_v49 = vpop.f32.mrf.mxu1 }
 0x255   : > { %v4941_v29 = vadd.f32 %v1653_v49, %v4828_v61 }
 0x256   : > { %v3679_v32 = vpop.f32.mrf.mxu1 }
 0x257   : > { %v4946_v20 = vadd.f32 %v3679_v32, %v4834_v23  ;;  %v4975_v32 = vpop.f32.mrf.mxu0 }
 0x258   : > { %v1666_v15 = vpop.f32.mrf.mxu1 }
 0x259   : > { %v4949_v48 = vadd.f32 %v1666_v15, %v4838_v22 }
 0x25a   : > { %v3680_v57 = vpop.f32.mrf.mxu1 }
 0x25b   : > { %v4954_v4 = vadd.f32 %v3680_v57, %v4842_v2 }
 0x25c   : > { %v1669_v19 = vpop.f32.mrf.mxu1 }
 0x25d   : > { %v4957_v61 = vadd.f32 %v1669_v19, %v4844_v58  ;;  %v4983_v19 = vpop.f32.mrf.mxu0 }
 0x25e   : > { %v3683_v44 = vpop.f32.mrf.mxu1  ;;  %5442 = vst [vmem:[#allocation7_spill] sm:$0xff] %v4983_v19 }
 0x25f   : > { %v4962_v23 = vadd.f32 %v3683_v44, %v4850_v41 }
 0x260   : > { %v1682_v52 = vpop.f32.mrf.mxu1 }
 0x261   : > { %v4965_v22 = vadd.f32 %v1682_v52, %v4857_v12 }
 0x262   : > { %v3684_v35 = vpop.f32.mrf.mxu1 }
 0x263   : > { %v4970_v2 = vadd.f32 %v3684_v35, %v4860_v40  ;;  %v1888_v35 = vadd.f32 %v4748_v1, %v4890_v50 }
 0x264   : > { %v1685_v49 = vpop.f32.mrf.mxu1 }
 0x265   : > { %v4973_v58 = vadd.f32 %v1685_v49, %v4864_v25  ;;  %v4993_v49 = vpop.f32.mrf.mxu0 }
 0x266   : > { %v3687_v15 = vpop.f32.mrf.mxu1 }
 0x267   : > { %v4978_v41 = vadd.f32 %v3687_v15, %v4869_v42 }
 0x268   : > { %v1698_v57 = vpop.f32.mrf.mxu1 }
 0x269   : > { %v4981_v12 = vadd.f32 %v1698_v57, %v4874_v26  ;;  %v1886_v26 = vadd.f32 %v4754_v9, %v4894_v13  ;;  %v1892_v9 = vadd.f32 %v4764_v56, %v4910_v30  ;;  %v1891_v56 = vadd.f32 %v4790_v0, %v4924_v54 }
 0x26a   : > { %v3688_v44 = vpop.f32.mrf.mxu1  ;;  %v1897_v0 = vadd.f32 %v4810_v62, %v4938_v34  ;;  %v5444_v62 = vld [vmem:[#allocation6_spill] sm:$0xff] }
 0x26b   : > { %v4986_v40 = vadd.f32 %v3688_v44, %v4877_v18  ;;  %v1889_v18 = vadd.f32 %v4756_v55, %v4900_v39  ;;  %v5436_v44 = vmov 0.0   ;;  %v1898_v34 = vadd.f32 %v5444_v62, %v4949_v48 }
 0x26c   : > { %v1701_v52 = vpop.f32.mrf.mxu1  ;;  %2876 = vmatprep.subr.mxu0 %v5436_v44  ;;  %v1904_v48 = vadd.f32 %v4854_v59, %v4962_v23  ;;  %v1903_v59 = vadd.f32 %v4879_v11, %v4973_v58 }
 0x26d   : > { %v4989_v25 = vadd.f32 %v1701_v52, %v4884_v37  ;;  %v5004_v37 = vpop.f32.mrf.mxu0  ;;  %v1887_v52 = vadd.f32 %v4762_v47, %v4904_v5  ;;  %v1893_v47 = vadd.f32 %v4780_v17, %v4920_v36  ;;  %v1894_v17 = vadd.f32 %v4804_v3, %v4934_v43 }
 0x26e   : > { %v3723_v42 = vpop.f32.mrf.mxu1  ;;  %v1909_v11 = vadd.f32 %v4906_v51, %v4986_v40  ;;  %v2862_v51 = vld [vmem:[%s5432_s5] sm:$0x3] }
 0x26f   : > { %v4995_v15 = vadd.f32 %v3723_v42, %v1888_v35  ;;  %v5014_v13 = vpop.f32.mrf.mxu0 }
 0x270   : > { %v1975_v57 = vpop.f32.mrf.mxu1 }
 0x271   : > { %v4999_v19 = vadd.f32 %v1975_v57, %v1886_v26  ;;  %v1890_v26 = vadd.f32 %v4774_v6, %v4914_v33  ;;  %v5024_v5 = vpop.f32.mrf.mxu0  ;;  %v1896_v6 = vadd.f32 %v4794_v31, %v4930_v38  ;;  %v1895_v31 = vadd.f32 %v4820_v28, %v4941_v29 }
 0x272   : > { %v3724_v1 = vpop.f32.mrf.mxu1  ;;  %v1901_v28 = vadd.f32 %v4840_v27, %v4954_v4  ;;  %v1902_v27 = vadd.f32 %v4862_v16, %v4965_v22  ;;  %v1908_v16 = vadd.f32 %v4886_v14, %v4978_v41  ;;  %v1907_v41 = vadd.f32 %v4916_v60, %v4989_v25 }
 0x273   : > { %v5006_v50 = vadd.f32 %v3724_v1, %v1889_v18  ;;  %v5034_v33 = vpop.f32.mrf.mxu0  ;;  %v2248_v60 = vadd.f32 %v4936_v63, %v4999_v19 }
 0x274   : > { %v1978_v35 = vpop.f32.mrf.mxu1 }
 0x275   : > { %v5010_v42 = vadd.f32 %v1978_v35, %v1887_v52  ;;  %v5044_v54 = vpop.f32.mrf.mxu0 }
 0x276   : > { %v3727_v55 = vpop.f32.mrf.mxu1 }
 0x277   : > { %v5016_v39 = vadd.f32 %v3727_v55, %v1892_v9  ;;  %v5054_v43 = vpop.f32.mrf.mxu0 }
 0x278   : > { %v1991_v57 = vpop.f32.mrf.mxu1 }
 0x279   : > { %v5020_v18 = vadd.f32 %v1991_v57, %v1890_v26  ;;  %v5064_v29 = vpop.f32.mrf.mxu0  ;;  %v2254_v19 = vadd.f32 %v4959_v24, %v5016_v39  ;;  %v5449_v24 = vld [vmem:[#allocation7_spill] sm:$0xff] }
 0x27a   : > { %v3728_v1 = vpop.f32.mrf.mxu1 }
 0x27b   : > { %v5026_v52 = vadd.f32 %v3728_v1, %v1893_v47 }
 0x27c   : > { %v1994_v30 = vpop.f32.mrf.mxu1 }
 0x27d   : > { %v5030_v35 = vadd.f32 %v1994_v30, %v1891_v56  ;;  %v5443_v56 = vld [vmem:[#allocation5_spill] sm:$0xff] }
 0x27e   : > { %v3731_v9 = vpop.f32.mrf.mxu1  ;;  %v1900_v3 = vadd.f32 %v5443_v56, %v4946_v20  ;;  %v1899_v20 = vadd.f32 %v4846_v46, %v4957_v61  ;;  %v1905_v46 = vadd.f32 %v4871_v10, %v4970_v2  ;;  %v1906_v10 = vadd.f32 %v4896_v21, %v4981_v12 }
 0x27f   : > { %v5036_v55 = vadd.f32 %v3731_v9, %v1896_v6  ;;  %v2250_v21 = vadd.f32 %v4926_v45, %v4995_v15  ;;  %v2251_v15 = vadd.f32 %v4943_v8, %v5006_v50  ;;  %v2252_v8 = vadd.f32 %v4967_v7, %v5020_v18 }
 0x280   : > { %v2007_v36 = vpop.f32.mrf.mxu1  ;;  %v2253_v39 = vadd.f32 %v5449_v24, %v5030_v35 }
 0x281   : > { %v5040_v26 = vadd.f32 %v2007_v36, %v1894_v17  ;;  %v2258_v7 = vadd.f32 %v4993_v49, %v5036_v55 }
 0x282   : > { %v3732_v57 = vpop.f32.mrf.mxu1 }
 0x283   : > { %v5046_v47 = vadd.f32 %v3732_v57, %v1897_v0 }
 0x284   : > { %v2010_v38 = vpop.f32.mrf.mxu1 }
 0x285   : > { %v5050_v1 = vadd.f32 %v2010_v38, %v1895_v31  ;;  %v5074_v38 = vpop.f32.mrf.mxu0 }
 0x286   : > { %v3735_v30 = vpop.f32.mrf.mxu1 }
 0x287   : > { %v5056_v6 = vadd.f32 %v3735_v30, %v1900_v3  ;;  %v5084_v61 = vpop.f32.mrf.mxu0 }
 0x288   : > { %v2023_v9 = vpop.f32.mrf.mxu1 }
 0x289   : > { %v5060_v17 = vadd.f32 %v2023_v9, %v1898_v34  ;;  %v5094_v22 = vpop.f32.mrf.mxu0 }
 0x28a   : > { %v3736_v36 = vpop.f32.mrf.mxu1 }
 0x28b   : > { %v5066_v0 = vadd.f32 %v3736_v36, %v1901_v28  ;;  %v5104_v58 = vpop.f32.mrf.mxu0 }
 0x28c   : > { %v2026_v57 = vpop.f32.mrf.mxu1 }
 0x28d   : > { %v5070_v31 = vadd.f32 %v2026_v57, %v1899_v20  ;;  %v2864_v20 = vlaneseq  ;;  %v3771_v40 = vpop.f32.mrf.mxu0 }
 0x28e   : > { %v3739_v56 = vpop.f32.mrf.mxu1 }
 0x28f   : > { %v5076_v3 = vadd.f32 %v3739_v56, %v1904_v48  ;;  %v2865_v56 = vshrl.u32 %v2864_v20, 7  ;;  %v2249_v20 = vadd.f32 %v4951_v53, %v5010_v42  ;;  %v2255_v53 = vadd.f32 %v4975_v32, %v5026_v52 }
 0x290   : > { %v2039_v4 = vpop.f32.mrf.mxu1  ;;  %v2256_v32 = vadd.f32 %v5004_v37, %v5040_v26 }
 0x291   : > { %v5080_v30 = vadd.f32 %v2039_v4, %v1902_v27  ;;  %v2870_v4 = vsub.s32 1, %v2865_v56  ;;  %v2866_v12 = vsub.s32 0, %v2865_v56 }
 0x292   : > { %v3740_v62 = vpop.f32.mrf.mxu1 }
 0x293   : > { %v5086_v34 = vadd.f32 %v3740_v62, %v1905_v46  ;;  %v5121_v25 = vrot.slane %v2862_v51, %v2866_v12 }
 0x294   : > { %v2042_v23 = vpop.f32.mrf.mxu1 }
 0x295   : > { %v5090_v9 = vadd.f32 %v2042_v23, %v1903_v59  ;;  %v2871_v59 = vrot.slane %v2862_v51, %v2870_v4  ;;  %5446 = vst [vmem:[#allocation6_spill] sm:$0xff] %v5121_v25  ;;  %v2267_v24 = vadd.f32 %v5094_v22, %v5086_v34  ;;  %v2262_v25 = vadd.f32 %v5034_v33, %v5056_v6 }
 0x296   : > { %v3743_v28 = vpop.f32.mrf.mxu1 }
 0x297   : > { %v5096_v36 = vadd.f32 %v3743_v28, %v1908_v16  ;;  %3319 = vmatprep.mubr.msk.f32.mxu0 %vm2873_vm5, %v2871_v59  ;;  %v2233_v28 = vpop.f32.mrf.mxu0 }
 0x298   : > { %v2055_v2 = vpop.f32.mrf.mxu1 }
 0x299   : > { %v5100_v57 = vadd.f32 %v2055_v2, %v1906_v10 }
 0x29a   : > { %v3744_v48 = vpop.f32.mrf.mxu1 }
 0x29b   : > { %v5106_v14 = vadd.f32 %v3744_v48, %v1909_v11  ;;  %v5136_v48 = vpop.f32.mrf.mxu0  ;;  %v2268_v34 = vadd.f32 %v2233_v28, %v5100_v57 }
 0x29c   : > { %v2058_v27 = vpop.f32.mrf.mxu1 }
 0x29d   : > { %v5110_v46 = vadd.f32 %v2058_v27, %v1907_v41  ;;  %v5146_v42 = vpop.f32.mrf.mxu0 }
 0x29e   : > { %v3779_v62 = vpop.f32.mrf.mxu1  ;;  %5448 = vst [vmem:[#allocation9_spill] sm:$0xff] %v5146_v42 }
 0x29f   : > { %5445 = vst [vmem:[#allocation5_spill] sm:$0xff] %v5110_v46  ;;  %v5117_v23 = vadd.f32 %v3779_v62, %v2250_v21  ;;  %v5156_v18 = vpop.f32.mrf.mxu0 }
 0x2a0   : > { %v2326_v16 = vpop.f32.mrf.mxu1 }
 0x2a1   : > { %v5124_v45 = vadd.f32 %v2326_v16, %v2248_v60  ;;  %v5164_v16 = vpop.f32.mrf.mxu0 }
 0x2a2   : > { %v3780_v10 = vpop.f32.mrf.mxu1  ;;  %5450 = vst [vmem:[#allocation7_spill] sm:$0xff] %v5164_v16  ;;  %v2259_v16 = vadd.f32 %v5014_v13, %v5046_v47  ;;  %v5238_v13 = vld [vmem:[%s5431_s4] ss:$0 sm:$0xff] }
 0x2a3   : > { %5447 = vst [vmem:[#allocation8_spill] sm:$0xff] %v5124_v45  ;;  %v5128_v2 = vadd.f32 %v3780_v10, %v2251_v15  ;;  %v5168_v10 = vpop.f32.mrf.mxu0 }
 0x2a4   : > { %v2329_v11 = vpop.f32.mrf.mxu1 }
 0x2a5   : > { %v5132_v63 = vadd.f32 %v2329_v11, %v2249_v20  ;;  %v5170_v55 = vpop.f32.mrf.mxu0 }
 0x2a6   : > { %v3783_v56 = vpop.f32.mrf.mxu1 }
 0x2a7   : > { %v5138_v41 = vadd.f32 %v3783_v56, %v2254_v19  ;;  %v2266_v56 = vadd.f32 %v5074_v38, %v5076_v3  ;;  %v5174_v37 = vpop.f32.mrf.mxu0  ;;  %v2265_v38 = vadd.f32 %v5104_v58, %v5090_v9 }
 0x2a8   : > { %v2342_v50 = vpop.f32.mrf.mxu1 }
 0x2a9   : > { %v5142_v27 = vadd.f32 %v2342_v50, %v2252_v8  ;;  %v2264_v50 = vadd.f32 %v5084_v61, %v5080_v30 }
 0x2aa   : > { %v3784_v4 = vpop.f32.mrf.mxu1 }
 0x2ab   : > { %v5148_v21 = vadd.f32 %v3784_v4, %v2255_v53 }
 0x2ac   : > { %v2345_v51 = vpop.f32.mrf.mxu1 }
 0x2ad   : > { %v5152_v12 = vadd.f32 %v2345_v51, %v2253_v39  ;;  %v5184_v39 = vpop.f32.mrf.mxu0 }
 0x2ae   : > { %v3787_v62 = vpop.f32.mrf.mxu1 }
 0x2af   : > { %v5158_v59 = vadd.f32 %v3787_v62, %v2258_v7  ;;  %v5193_v30 = vpop.f32.mrf.mxu0 }
 0x2b0   : > { %v2358_v52 = vpop.f32.mrf.mxu1 }
 0x2b1   : > { %v5162_v60 = vadd.f32 %v2358_v52, %v2256_v32  ;;  %v2270_v32 = vadd.f32 %v3771_v40, %v5096_v36 }
 0x2b2   : > { %v3788_v35 = vpop.f32.mrf.mxu1 }
 0x2b4   : > { %v5166_v15 = vpop.f32.mrf.mxu1 }
 0x2b6   : > { %v3791_v20 = vpop.f32.mrf.mxu1 }
 0x2b8   : > { %v2374_v49 = vpop.f32.mrf.mxu1 }
 0x2ba   : > { %v3792_v11 = vpop.f32.mrf.mxu1 }
 0x2bc   : > { %v2377_v19 = vpop.f32.mrf.mxu1 }
 0x2be   : > { %v3795_v26 = vpop.f32.mrf.mxu1 }
 0x2bf   : > { %v5176_v8 = vadd.f32 %v3795_v26, %v2266_v56  ;;  %v5200_v26 = vpop.f32.mrf.mxu0 }
 0x2c0   : > { %v2390_v53 = vpop.f32.mrf.mxu1 }
 0x2c1   : > { %5451 = vst [vmem:[#allocation10_spill] sm:$0xff] %v5176_v8  ;;  %v5180_v4 = vadd.f32 %v2390_v53, %v2264_v50  ;;  %v3815_v58 = vpop.f32.mrf.mxu0  ;;  %v2435_v8 = vadd.f32 %v3791_v20, %v2262_v25  ;;  %v2432_v25 = vadd.f32 %v3788_v35, %v2259_v16 }
 0x2c2   : > { %v3796_v51 = vpop.f32.mrf.mxu1 }
 0x2c3   : > { %5452 = vst [vmem:[#allocation11_spill] sm:$0xff] %v5180_v4  ;;  %v5186_v7 = vadd.f32 %v3796_v51, %v2267_v24  ;;  %v2542_v40 = vpop.f32.mrf.mxu0 }
 0x2c4   : > { %v2393_v3 = vpop.f32.mrf.mxu1 }
 0x2c5   : > { %5453 = vst [vmem:[#allocation12_spill] sm:$0xff] %v5186_v7  ;;  %v5190_v62 = vadd.f32 %v2393_v3, %v2265_v38  ;;  %v3816_v57 = vpop.f32.mrf.mxu0  ;;  %v2263_v7 = vadd.f32 %v5054_v43, %v5066_v0 }
 0x2c6   : > { %v3799_v61 = vpop.f32.mrf.mxu1  ;;  %v2616_v47 = vadd.f32 %v3816_v57, %v2432_v25 }
 0x2c7   : > { %5454 = vst [vmem:[#allocation13_spill] sm:$0xff] %v5190_v62  ;;  %v5195_v52 = vadd.f32 %v3799_v61, %v2270_v32  ;;  %v2545_v3 = vpop.f32.mrf.mxu0 }
 0x2c8   : > { %v2406_v22 = vpop.f32.mrf.mxu1 }
 0x2c9   : > { %5455 = vst [vmem:[#allocation14_spill] sm:$0xff] %v5195_v52  ;;  %v5198_v56 = vadd.f32 %v2406_v22, %v2268_v34  ;;  %v3819_v34 = vpop.f32.mrf.mxu0  ;;  %v2260_v52 = vadd.f32 %v5044_v54, %v5060_v17  ;;  %v2257_v54 = vadd.f32 %v5024_v5, %v5050_v1 }
 0x2ca   : > { %v5202_v50 = vpop.f32.mrf.mxu1  ;;  %v2619_v42 = vadd.f32 %v3819_v34, %v2435_v8  ;;  %v5460_v34 = vmov 0.0  }
 0x2cb   : > { %5456 = vst [vmem:[#allocation15_spill] sm:$0xff] %v5198_v56  ;;  %v2558_v4 = vpop.f32.mrf.mxu0  ;;  %v2433_v33 = vadd.f32 %v2374_v49, %v2260_v52 }
 0x2cc   : > { %v5204_v9 = vpop.f32.mrf.mxu1 }
 0x2cd   : > { %5457 = vst [vmem:[#allocation16_spill] sm:$0xff] %v5204_v9  ;;  %v2261_v9 = vadd.f32 %v5064_v29, %v5070_v31  ;;  %v2430_v31 = vadd.f32 %v5166_v15, %v2257_v54 }
 0x2ce   : > { %v5206_v53 = vpop.f32.mrf.mxu1 }
 0x2cf   : > { %v2434_v6 = vadd.f32 %v2377_v19, %v2261_v9  ;;  %v2615_v19 = vadd.f32 %v3815_v58, %v5158_v59 }
 0x2d0   : > { %v5208_v36 = vpop.f32.mrf.mxu1 }
 0x2d1   : > { %5458 = vst [vmem:[#allocation17_spill] sm:$0xff] %v5208_v36  ;;  %v2436_v36 = vadd.f32 %v3792_v11, %v2263_v7  ;;  %v2617_v11 = vadd.f32 %v2558_v4, %v2433_v33  ;;  %v2613_v33 = vadd.f32 %v2542_v40, %v5162_v60  ;;  %v2611_v60 = vadd.f32 %v5174_v37, %v5138_v41 }
 0x2d2   : > { %v5210_v24 = vpop.f32.mrf.mxu1  ;;  %v2609_v37 = vadd.f32 %v5184_v39, %v5142_v27  ;;  %v2271_v27 = vadd.f32 %v5136_v48, %v5106_v14  ;;  %v2607_v39 = vadd.f32 %v5156_v18, %v5117_v23  ;;  %v5461_v18 = vld [vmem:[#allocation5_spill] sm:$0xff] }
 0x2d4   : > { %v5212_v51 = vpop.f32.mrf.mxu1  ;;  %v2444_v14 = vadd.f32 %v5202_v50, %v2271_v27  ;;  %v2785_v48 = vadd.f32 %v5206_v53, %v2607_v39  ;;  %v5466_v53 = vld [vmem:[#allocation16_spill] sm:$0xff] }
 0x2d5   : > { %5459 = vst [vmem:[#allocation18_spill] sm:$0xff] %v5212_v51  ;;  %v3820_v51 = vpop.f32.mrf.mxu0 }
 0x2d6   : > { %v5214_v28 = vpop.f32.mrf.mxu1  ;;  %v2620_v43 = vadd.f32 %v3820_v51, %v2436_v36  ;;  %v2614_v36 = vadd.f32 %v2545_v3, %v2430_v31  ;;  %v2612_v3 = vadd.f32 %v5193_v30, %v5148_v21  ;;  %v2610_v21 = vadd.f32 %v5200_v26, %v5152_v12 }
 0x2d7   : > { %v2561_v0 = vpop.f32.mrf.mxu0  ;;  %v2608_v12 = vadd.f32 %v5168_v10, %v5128_v2  ;;  %v2606_v10 = vadd.f32 %v5170_v55, %v5132_v63 }
 0x2d8   : > { %v5216_v38 = vpop.f32.mrf.mxu1  ;;  %v2618_v29 = vadd.f32 %v2561_v0, %v2434_v6 }
 0x2d9   : > { %v5242_v5 = vpop.f32.mrf.mxu0  ;;  %v2787_v31 = vadd.f32 %v5216_v38, %v2609_v37 }
 0x2da   : > { %v5218_v32 = vpop.f32.mrf.mxu1 }
 0x2db   : > { %v5251_v57 = vpop.f32.mrf.mxu0  ;;  %v2818_v23 = vadd.f32 %v5238_v13, %v2787_v31  ;;  %v5471_v31 = vld [vmem:[#allocation10_spill] sm:$0xff] }
 0x2dc   : > { %v5220_v61 = vpop.f32.mrf.mxu1  ;;  %v5465_v55 = vld [vmem:[#allocation18_spill] sm:$0xff] }
 0x2de   : > { %v3843_v22 = vpop.f32.mrf.mxu1 }
 0x2df   : > { %v2793_v9 = vadd.f32 %v3843_v22, %v2615_v19  ;;  %v5464_v19 = vld [vmem:[#allocation7_spill] sm:$0xff] }
 0x2e0   : > { %v2720_v44 = vpop.f32.mrf.mxu1 }
 0x2e1   : > { %v2824_v22 = vadd.f32 %v5238_v13, %v2793_v9  ;;  %v2791_v25 = vadd.f32 %v2720_v44, %v2613_v33  ;;  %v2789_v44 = vadd.f32 %v5214_v28, %v2611_v60 }
 0x2e2   : > { %v3844_v62 = vpop.f32.mrf.mxu1 }
 0x2e3   : > { %v2794_v15 = vadd.f32 %v3844_v62, %v2616_v47  ;;  %v2848_v30 = vmax.f32 %v2824_v22, 0.0  ;;  %v2820_v26 = vadd.f32 %v5238_v13, %v2789_v44  ;;  %v5468_v22 = vld [vmem:[#allocation14_spill] sm:$0xff] }
 0x2e4   : > { %v2723_v56 = vpop.f32.mrf.mxu1 }
 0x2e5   : > { %v2825_v59 = vadd.f32 %v5238_v13, %v2794_v15  ;;  %v2792_v62 = vadd.f32 %v2723_v56, %v2614_v36  ;;  %v2790_v56 = vadd.f32 %v5218_v32, %v2612_v3 }
 0x2e6   : > { %v3847_v45 = vpop.f32.mrf.mxu1 }
 0x2e7   : > { %v2797_v46 = vadd.f32 %v3847_v45, %v2619_v42  ;;  %v2849_v40 = vmax.f32 %v2825_v59, 0.0  ;;  %v2823_v0 = vadd.f32 %v5238_v13, %v2792_v62  ;;  %v2821_v32 = vadd.f32 %v5238_v13, %v2790_v56 }
 0x2e8   : > { %v2736_v20 = vpop.f32.mrf.mxu1  ;;  %v2842_v59 = vmax.f32 %v2818_v23, 0.0 }
 0x2e9   : > { %v2828_v45 = vadd.f32 %v5238_v13, %v2797_v46  ;;  %v2795_v42 = vadd.f32 %v2736_v20, %v2617_v11  ;;  %v2788_v11 = vadd.f32 %v5220_v61, %v2610_v21  ;;  %v2786_v61 = vadd.f32 %v5210_v24, %v2608_v12  ;;  %v5462_v24 = vld [vmem:[#allocation9_spill] sm:$0xff] }
 0x2ea   : > { %v3848_v17 = vpop.f32.mrf.mxu1 }
 0x2eb   : > { %v2798_v7 = vadd.f32 %v3848_v17, %v2620_v43  ;;  %v2852_v51 = vmax.f32 %v2828_v45, 0.0  ;;  %v2826_v46 = vadd.f32 %v5238_v13, %v2795_v42  ;;  %v5262_v43 = vpop.f32.mrf.mxu0  ;;  %v2822_v17 = vadd.f32 %v5238_v13, %v2791_v25 }
 0x2ec   : > { %v2739_v16 = vpop.f32.mrf.mxu1  ;;  %v2819_v45 = vadd.f32 %v5238_v13, %v2788_v11  ;;  %v2844_v42 = vmax.f32 %v2820_v26, 0.0  ;;  %v2817_v63 = vadd.f32 %v5238_v13, %v2786_v61 }
 0x2ed   : > { %v2829_v35 = vadd.f32 %v5238_v13, %v2798_v7  ;;  %v2796_v49 = vadd.f32 %v2739_v16, %v2618_v29  ;;  %v2850_v20 = vmax.f32 %v2826_v46, 0.0  ;;  %v5276_v41 = vpop.f32.mrf.mxu0  ;;  %v2847_v7 = vmax.f32 %v2823_v0, 0.0  ;;  %v5467_v46 = vld [vmem:[#allocation17_spill] sm:$0xff] }
 0x2ee   : > { %v5244_v1 = vpop.f32.mrf.mxu1  ;;  %v2846_v47 = vmax.f32 %v2822_v17, 0.0  ;;  %v2845_v16 = vmax.f32 %v2821_v32, 0.0  ;;  %v5469_v17 = vld [vmem:[#allocation15_spill] sm:$0xff] }
 0x2ef   : > { %v2853_v8 = vmax.f32 %v2829_v35, 0.0  ;;  %v2827_v4 = vadd.f32 %v5238_v13, %v2796_v49  ;;  %v3827_v28 = vpop.f32.mrf.mxu0  ;;  %v2269_v35 = vadd.f32 %v5462_v24, %v5461_v18  ;;  %v5463_v49 = vld [vmem:[#allocation8_spill] sm:$0xff] }
 0x2f0   : > { %v5248_v52 = vpop.f32.mrf.mxu1  ;;  %v2605_v15 = vadd.f32 %v5464_v19, %v5463_v49  ;;  %v2627_v25 = vadd.f32 %v3827_v28, %v5468_v22  ;;  %v5470_v28 = vld [vmem:[#allocation12_spill] sm:$0xff]  ;;  %v5474_v49 = vld [vmem:[#allocation6_spill] sm:$0xff] }
 0x2f1   : > { %2877 = vmatpush1.msra.mxu0 %v2853_v8  ;;  %v2851_v58 = vmax.f32 %v2827_v4, 0.0  ;;  %v2590_v2 = vpop.f32.mrf.mxu0  ;;  %v2784_v8 = vadd.f32 %v5465_v55, %v2606_v10  ;;  %v2843_v4 = vmax.f32 %v2819_v45, 0.0  ;;  %v2442_v9 = vadd.f32 %v5466_v53, %v2269_v35  ;;  %v2953_v35 = vld [vmem:[%s5433_s6 + $0x38] sm:$0xff]  ;;  %v2951_v19 = vld [vmem:[%s5433_s6 + $0x28] sm:$0xff]  ;;  %v2948_v55 = vld [vmem:[%s5433_s6 + $0x10] sm:$0xff] }
 0x2f2   : > { %2878 = vmatprep.subr.mxu0 %v5460_v34  ;;  %v5256_v6 = vpop.f32.mrf.mxu1  ;;  %v2783_v33 = vadd.f32 %v5467_v46, %v2605_v15  ;;  %v2625_v37 = vadd.f32 %v2590_v2, %v5469_v17  ;;  %v2624_v12 = vadd.f32 %v5262_v43, %v5470_v28  ;;  %v5472_v43 = vld [vmem:[#allocation13_spill] sm:$0xff] }
 0x2f3   : > { %2879 = vmatpush1.msra.mxu0 %v2852_v51  ;;  %v3828_v50 = vpop.f32.mrf.mxu0  ;;  %v2816_v51 = vadd.f32 %v5238_v13, %v2785_v48  ;;  %v2815_v3 = vadd.f32 %v5238_v13, %v2784_v8  ;;  %v2622_v45 = vadd.f32 %v5276_v41, %v5472_v43  ;;  %v2950_v15 = vld [vmem:[%s5433_s6 + $0x20] sm:$0xff]  ;;  %v2947_v8 = vld [vmem:[%s5433_s6 + $0x8] sm:$0xff] }
 0x2f4   : > { %2880 = vmatprep.subr.mxu0 %v5460_v34  ;;  %v5269_v54 = vpop.f32.mrf.mxu1  ;;  %v2628_v62 = vadd.f32 %v3828_v50, %v2444_v14  ;;  %v2814_v0 = vadd.f32 %v5238_v13, %v2783_v33  ;;  %v2802_v27 = vadd.f32 %v5256_v6, %v2624_v12 }
 0x2f5   : > { %2881 = vmatpush1.msra.mxu0 %v2851_v58  ;;  %v2841_v58 = vmax.f32 %v2817_v63, 0.0  ;;  %v2593_v60 = vpop.f32.mrf.mxu0  ;;  %v2800_v14 = vadd.f32 %v5269_v54, %v2622_v45  ;;  %v2949_v63 = vld [vmem:[%s5433_s6 + $0x18] sm:$0xff] }
 0x2f6   : > { %2882 = vmatprep.subr.mxu0 %v5460_v34  ;;  %v3855_v29 = vpop.f32.mrf.mxu1  ;;  %v2626_v21 = vadd.f32 %v2593_v60, %v2442_v9  ;;  %v2954_v9 = vld [vmem:[%s5434_s7] sm:$0x1] }
 0x2f7   : > { %2883 = vmatpush1.msra.mxu0 %v2850_v20  ;;  %v2805_v44 = vadd.f32 %v3855_v29, %v2627_v25  ;;  %v2831_v18 = vadd.f32 %v5238_v13, %v2800_v14 }
 0x2f8   : > { %2884 = vmatprep.subr.mxu0 %v5460_v34  ;;  %v2768_v38 = vpop.f32.mrf.mxu1 }
 0x2f9   : > { %2885 = vmatpush1.msra.mxu0 %v2849_v40  ;;  %v2840_v40 = vmax.f32 %v2816_v51, 0.0  ;;  %v2836_v26 = vadd.f32 %v5238_v13, %v2805_v44  ;;  %v2803_v29 = vadd.f32 %v2768_v38, %v2625_v37  ;;  %v2833_v38 = vadd.f32 %v5238_v13, %v2802_v27 }
 0x2fa   : > { %2886 = vmatprep.subr.mxu0 %v5460_v34  ;;  %v3856_v36 = vpop.f32.mrf.mxu1  ;;  %v2855_v24 = vmax.f32 %v2831_v18, 0.0 }
 0x2fb   : > { %2887 = vmatpush1.msra.mxu0 %v2848_v30  ;;  %v2806_v20 = vadd.f32 %v3856_v36, %v2628_v62  ;;  %v2839_v30 = vmax.f32 %v2815_v3, 0.0  ;;  %v2860_v2 = vmax.f32 %v2836_v26, 0.0  ;;  %v2834_v10 = vadd.f32 %v5238_v13, %v2803_v29 }
 0x2fc   : > { %2888 = vmatprep.subr.mxu0 %v5460_v34  ;;  %v2771_v56 = vpop.f32.mrf.mxu1  ;;  %v2857_v23 = vmax.f32 %v2833_v38, 0.0 }
 0x2fd   : > { %2889 = vmatpush1.msra.mxu0 %v2847_v7  ;;  %v2837_v32 = vadd.f32 %v5238_v13, %v2806_v20  ;;  %v2804_v11 = vadd.f32 %v2771_v56, %v2626_v21  ;;  %v2838_v7 = vmax.f32 %v2814_v0, 0.0 }
 0x2fe   : > { %2890 = vmatprep.subr.mxu0 %v5460_v34 }
 0x2ff   : > { %2891 = vmatpush1.msra.mxu0 %v2846_v47  ;;  %v2623_v47 = vadd.f32 %v5242_v5, %v5471_v31  ;;  %v2861_v39 = vmax.f32 %v2837_v32, 0.0  ;;  %v2835_v61 = vadd.f32 %v5238_v13, %v2804_v11  ;;  %v5473_v5 = vld [vmem:[#allocation11_spill] sm:$0xff] }
 0x300   : > { %2892 = vmatprep.subr.mxu0 %v5460_v34  ;;  %v2621_v6 = vadd.f32 %v5251_v57, %v5473_v5 }
 0x301   : > { %2893 = vmatpush1.msra.mxu0 %v2845_v16  ;;  %v2801_v16 = vadd.f32 %v5244_v1, %v2623_v47  ;;  %v2859_v48 = vmax.f32 %v2835_v61, 0.0 }
 0x302   : > { %2894 = vmatprep.subr.mxu0 %v5460_v34  ;;  %v2799_v41 = vadd.f32 %v5248_v52, %v2621_v6 }
 0x303   : > { %2895 = vmatpush1.msra.mxu0 %v2844_v42  ;;  %v2832_v1 = vadd.f32 %v5238_v13, %v2801_v16  ;;  %v2858_v42 = vmax.f32 %v2834_v10, 0.0 }
 0x304   : > { %2896 = vmatprep.subr.mxu0 %v5460_v34  ;;  %v2830_v54 = vadd.f32 %v5238_v13, %v2799_v41  ;;  %v2952_v13 = vld [vmem:[%s5433_s6 + $0x30] sm:$0xff] }
 0x305   : > { %2897 = vmatpush1.msra.mxu0 %v2843_v4  ;;  %v2856_v57 = vmax.f32 %v2832_v1, 0.0  ;;  %v2946_v4 = vld [vmem:[%s5433_s6] sm:$0xff] }
 0x306   : > { %2898 = vmatprep.subr.mxu0 %v5460_v34  ;;  %v2854_v52 = vmax.f32 %v2830_v54, 0.0 }
 0x307   : > { %2899 = vmatpush1.msra.mxu0 %v2842_v59 }
 0x308   : > { %2900 = vmatprep.subr.mxu0 %v5460_v34 }
 0x309   : > { %2901 = vmatpush1.msra.mxu0 %v2841_v58 }
 0x30a   : > { %2902 = vmatprep.subr.mxu0 %v5460_v34 }
 0x30b   : > { %2903 = vmatpush1.msra.mxu0 %v2840_v40 }
 0x30c   : > { %2904 = vmatprep.subr.mxu0 %v5460_v34 }
 0x30d   : > { %2905 = vmatpush1.msra.mxu0 %v2839_v30 }
 0x30e   : > { %2906 = vmatprep.subr.mxu0 %v5460_v34 }
 0x30f   : > { %2907 = vmatpush1.msra.mxu0 %v2838_v7 }
 0x310   : > { %2924 = vmatprep.subr.mxu0 %v5460_v34 }
 0x311   : > { %2925 = vmatpush2.msra.mxu0 %v2861_v39 }
 0x312   : > { %2926 = vmatprep.subr.mxu0 %v5460_v34 }
 0x313   : > { %2927 = vmatpush2.msra.mxu0 %v2860_v2 }
 0x314   : > { %2928 = vmatprep.subr.mxu0 %v5460_v34 }
 0x315   : > { %2929 = vmatpush2.msra.mxu0 %v2859_v48 }
 0x316   : > { %2930 = vmatprep.subr.mxu0 %v5460_v34 }
 0x317   : > { %2931 = vmatpush2.msra.mxu0 %v2858_v42 }
 0x318   : > { %2932 = vmatprep.subr.mxu0 %v5460_v34 }
 0x319   : > { %2933 = vmatpush2.msra.mxu0 %v2857_v23 }
 0x31a   : > { %2934 = vmatprep.subr.mxu0 %v5460_v34 }
 0x31b   : > { %2935 = vmatpush2.msra.mxu0 %v2856_v57 }
 0x31c   : > { %2936 = vmatprep.subr.mxu0 %v5460_v34 }
 0x31d   : > { %2937 = vmatpush2.msra.mxu0 %v2855_v24 }
 0x31e   : > { %2938 = vmatprep.subr.mxu0 %v5460_v34 }
 0x31f   : > { %2939 = vmatpush2.msra.mxu0 %v2854_v52 }
 0x320   : > { %2941 = vmatmul.mubr.f32.vlgmr.msra.gmra.mxu0 %v5474_v49  ;;  %3857 = vmatprep.subr.mxu0 %v5460_v34 }
 0x321   : > { %3858 = vmatpush3.msra.mxu0 %v2953_v35  ;;  %3873 = vmatprep.mubr.msk.f32.mxu0 %vm4002_vm6, %v5460_v34 }
 0x322   : > { %3859 = vmatprep.subr.mxu0 %v5460_v34 }
 0x323   : > { %3860 = vmatpush3.msra.mxu0 %v2952_v13 }
 0x324   : > { %3861 = vmatprep.subr.mxu0 %v5460_v34 }
 0x325   : > { %3862 = vmatpush3.msra.mxu0 %v2951_v19 }
 0x326   : > { %3863 = vmatprep.subr.mxu0 %v5460_v34 }
 0x327   : > { %3864 = vmatpush3.msra.mxu0 %v2950_v15 }
 0x328   : > { %3865 = vmatprep.subr.mxu0 %v5460_v34 }
 0x329   : > { %3866 = vmatpush3.msra.mxu0 %v2949_v63 }
 0x32a   : > { %3867 = vmatprep.subr.mxu0 %v5460_v34 }
 0x32b   : > { %3868 = vmatpush3.msra.mxu0 %v2948_v55 }
 0x32c   : > { %3869 = vmatprep.subr.mxu0 %v5460_v34 }
 0x32d   : > { %3870 = vmatpush3.msra.mxu0 %v2947_v8 }
 0x32e   : > { %3871 = vmatprep.subr.mxu0 %v5460_v34 }
 0x32f   : > { %3872 = vmatpush3.msra.mxu0 %v2946_v4 }
 0x3e0   : > { %v2942_v50 = vpop.f32.mrf.mxu0 }
 0x3e1   : > { %3874 = vmatmul.mubr.msk.f32.vlgmr.msra.gmra.mxu0 %vm2873_vm5, %v2942_v50 }
 0x3e2   : > { %v2944_v53 = vpop.f32.mrf.mxu0 }
 0x4a1   : > { %v3024_v36 = vpop.f32.mrf.mxu0 }
 0x4a2   : > { %v3025_v51 = vadd.f32 %v3024_v36, %v2954_v9 }
 0x4a3   : > { %v3875_v34 = vpop.f32.mrf.mxu0 }
 0x4a4   : > { %3028 = vst [vmem:[%s298_s23] sm:$0x1] %v3025_v51 }
 0x4a5   : > { %3952 = shalt.err (!%p3949_p3)
}
 0x4a6   : > { %s3953_s20 = scalar_lea.hbm %s5392_s10, 16  ;;  %s3957_s22 = scalar_lea.hbm %s5435_s8, 32 }
 0x4a7   : > { %p3954_p4 = scmp.ne.s32.totalorder %s5392_s10, %s3953_s20  ;;  %p3958_p9 = scmp.lt.s32.totalorder %s5392_s10, %s5435_s8 }
 0x4a8   : > { %p3959_p10 = scmp.lt.s32.totalorder %s3957_s22, %s3953_s20 }
 0x4a9   : > { %p3955_p7 = pnand %p3954_p4, %p4087_p5 }
 0x4aa   : > { %p3960_p11 = por %p3959_p10, %p3958_p9 }
 0x4ab   : > { %p3956_p8 = pneg %p3955_p7 }
 0x4ad   : > { %p3961_p12 = pnand %p3960_p11, %p3956_p8 }
 0x4af   : > { %3964 = shalt.err (!%p3961_p12)
}
 0x4b0   : > { %3880 = dma.vmem_to_hbm [thread:$0]  (%p4087_p5), %s3043_s24, 16, %s5392_s10, %s3030_s12  }
 0x4b1 PF: > { %p3886_p13 = scmp.ge.s32.totalorder %s3999_s30, 2  ;;  %s3054_s26 = sand.u32 1, %s3987_s27  }
 0x4b2   : > { %s3055_s13 = scalar_lea.sflag [#allocation3], %s3054_s26 }
 0x4b3   : > { %p3883_p0 = pnand %p3886_p13, %p4091_p6 }
 0x4b5   : > { %p3884_p1 = pneg %p3883_p0 }
 0x4b7   : > { %3982 = dma.done.wait (%p3884_p1), %s3055_s13, 16  }
 0x4b8   : > { %3984 = vsyncadd (%p3884_p1), %s3055_s13, 4294967280  ;;  %p18_p2 = scmp.ge.s32.totalorder %s4074_s11, 4   ;;  %s5475_s27 = smov %s3991_s28 }
 0x4b9   : > { %s5476_s28 = smov %s3995_s29  ;;  %s5477_s29 = smov %s4085_s14 }
 0x4ba   : > { %s5478_s30 = smov %s4074_s11  ;;  %20 = sbr.rel (!%p18_p2) target bundleno = 3 (0x3), region = 95 }
 0x4bf   :  { %3059 = vsyncpa [#allocation3], 1 }
 0x4c0   :  { %3061 = vsyncpa [#allocation3 + $0x1], 1 }

</bundles_post_ra>
